<compile_context>
chip_gen: v6e
topology: v6e:2x2x1
jax: 0.10.0
libtpu: 0.0.40
codegen_flags: <defaults>
</compile_context>

<pallas_src>
import functools
import math

import jax
import jax.numpy as jnp
from jax.experimental import pallas as pl
from jax.experimental.pallas import tpu as pltpu

# ----------------------------- model config ---------------------------------
VOCAB = 32
MAX_POS = 32
HIDDEN = 32
NUM_HEADS = 2
HEAD_DIM = HIDDEN // NUM_HEADS
INTERMEDIATE = 64
NUM_LAYERS = 2
NUM_LABELS = 5
NUM_HEAD_OUT = NUM_LABELS + 2          # [sst logits (5) | para logit | sts logit]
LN_EPS = 1e-12
LANES = 128
OUT_WIDTH = 128                         # lane-dense packed output width

# ---- packed-slab row layout --------------------------------------------------
# per-layer bias / LayerNorm slab: (L, 8, 128) f32
ROW_QKV_B, ROW_O_B, ROW_LN1_G, ROW_LN1_B, ROW_FF1_B, ROW_FF2_B, ROW_LN2_G, ROW_LN2_B = range(8)
# per-layer weight slab: (L, 160, 128) bf16
W_QKV_R0 = 0                            # (HIDDEN, 3*HIDDEN)
W_O_R0 = HIDDEN                         # (HIDDEN, HIDDEN)
W_FF1_R0 = 2 * HIDDEN                   # (HIDDEN, INTERMEDIATE)
W_FF2_R0 = 3 * HIDDEN                   # (INTERMEDIATE, HIDDEN)
W_SLAB_ROWS = 3 * HIDDEN + INTERMEDIATE  # 160
# misc slab: (8 + HIDDEN, 128) f32
GROW_EMB_G, GROW_EMB_B, GROW_POOL_B, GROW_HEAD_B = range(4)
POOLHEAD_R0 = 8                         # rows 8:40 lanes [0:32]=pool_w, [32:39]=head_w
MISC_ROWS = 8 + HIDDEN                  # 40


# --------------------------- fused Pallas kernel ------------------------------


def _fused_bert_kernel(x_ref, mask_ref, misc_ref, lvec_ref, wslab_ref, out_ref,
                       *, batch, seq):
    """Mini-BERT forward + pooler + all task heads in one grid step.

    x_ref    : (BT, S, H)   summed word+pos+type embeddings (pre-LayerNorm)
    mask_ref : (BT, S)      additive key-mask bias (0 / -10000)
    misc_ref : (40, 128)    emb-LN vecs, pooler/head bias, pooler+head weights
    lvec_ref : (L, 8, 128)  per-layer biases / LayerNorm params
    wslab_ref: (L, 160,128) per-layer matmul weights (bf16)
    out_ref  : (BT, 128)    packed lane-dense output
    """
    scale = 1.0 / math.sqrt(HEAD_DIM)
    m = batch * seq

    def layernorm(v, g, b):
        mu = jnp.mean(v, axis=-1, keepdims=True)
        var = jnp.mean(jnp.square(v - mu), axis=-1, keepdims=True)
        return (v - mu) * jax.lax.rsqrt(var + LN_EPS) * g + b

    def misc_vec(row, width):
        return misc_ref[pl.ds(row, 1), pl.ds(0, width)]            # (1, width)

    def layer_vec(layer, row, width):
        return lvec_ref[layer, pl.ds(row, 1), pl.ds(0, width)]     # (1, width)

    def weight(layer, r0, nrows, ncols):
        return wslab_ref[layer, pl.ds(r0, nrows), pl.ds(0, ncols)]  # bf16

    # ---- embedding LayerNorm --------------------------------------------------
    x = x_ref[...].reshape(m, HIDDEN)
    x = layernorm(x, misc_vec(GROW_EMB_G, HIDDEN), misc_vec(GROW_EMB_B, HIDDEN))

    # ---- mask bias: broadcast ONCE before the unrolled layer/head loops -------
    mask_b = jnp.broadcast_to(mask_ref[...].reshape(batch, 1, seq),
                              (batch, seq, seq))

    for layer in range(NUM_LAYERS):                                 # unrolled
        # fused QKV projection (bf16 operands, f32 accumulate)
        qkv = jnp.dot(x.astype(jnp.bfloat16),
                      weight(layer, W_QKV_R0, HIDDEN, 3 * HIDDEN),
                      preferred_element_type=jnp.float32)
        qkv = qkv + layer_vec(layer, ROW_QKV_B, 3 * HIDDEN)
        qkv = qkv.reshape(batch, seq, 3 * HIDDEN).astype(jnp.bfloat16)

        # TODO(synk): heads kept as a 2-iteration unrolled loop; Pallas TPU
        # dot_general only reliably lowers single-batch-dim (3-D) einsums, so the
        # multi-batch 'bqhd,bkhd->bhqk' form is avoided for compile safety.
        ctx_heads = []
        for h in range(NUM_HEADS):
            lo = h * HEAD_DIM
            qh = qkv[:, :, lo:lo + HEAD_DIM]
            kh = qkv[:, :, HIDDEN + lo:HIDDEN + lo + HEAD_DIM]
            vh = qkv[:, :, 2 * HIDDEN + lo:2 * HIDDEN + lo + HEAD_DIM]

            s = jnp.einsum("bqd,bkd->bqk", qh, kh,
                           preferred_element_type=jnp.float32) * scale
            s = s + mask_b                                           # key mask
            s = s - jnp.max(s, axis=-1, keepdims=True)
            p = jnp.exp(s)
            p = p / jnp.sum(p, axis=-1, keepdims=True)               # exact softmax
            ctx = jnp.einsum("bqk,bkd->bqd", p.astype(jnp.bfloat16), vh,
                             preferred_element_type=jnp.float32)
            ctx_heads.append(ctx.reshape(m, HEAD_DIM))

        # single output projection over the lane-concatenated heads
        ctx_all = jnp.concatenate(ctx_heads, axis=-1)                # (M, H)
        attn = jnp.dot(ctx_all.astype(jnp.bfloat16),
                       weight(layer, W_O_R0, HIDDEN, HIDDEN),
                       preferred_element_type=jnp.float32)
        attn = attn + layer_vec(layer, ROW_O_B, HIDDEN)

        # add & norm
        x = layernorm(x + attn,
                      layer_vec(layer, ROW_LN1_G, HIDDEN),
                      layer_vec(layer, ROW_LN1_B, HIDDEN))

        # feed-forward
        ff = jnp.dot(x.astype(jnp.bfloat16),
                     weight(layer, W_FF1_R0, HIDDEN, INTERMEDIATE),
                     preferred_element_type=jnp.float32)
        ff = ff + layer_vec(layer, ROW_FF1_B, INTERMEDIATE)
        # TODO(synk): HF BERT uses exact (erf) GELU; tanh approximation used here.
        ff = jax.nn.gelu(ff, approximate=True)
        ff = jnp.dot(ff.astype(jnp.bfloat16),
                     weight(layer, W_FF2_R0, INTERMEDIATE, HIDDEN),
                     preferred_element_type=jnp.float32)
        ff = ff + layer_vec(layer, ROW_FF2_B, HIDDEN)
        x = layernorm(x + ff,
                      layer_vec(layer, ROW_LN2_G, HIDDEN),
                      layer_vec(layer, ROW_LN2_B, HIDDEN))

    # ---- pooler on the [CLS] token ---------------------------------------------
    # TODO(synk): a strided row gather (stride=seq) would avoid the reshape, but
    # strided value slices are not reliably lowered by Mosaic; reshape+slice kept.
    cls = x.reshape(batch, seq, HIDDEN)[:, 0:1, :].reshape(batch, HIDDEN)
    pool_head_w = misc_ref[pl.ds(POOLHEAD_R0, HIDDEN),
                           pl.ds(0, HIDDEN + NUM_HEAD_OUT)]          # (32, 39) f32
    pooled = jnp.tanh(
        jnp.dot(cls, pool_head_w[:, :HIDDEN], preferred_element_type=jnp.float32)
        + misc_vec(GROW_POOL_B, HIDDEN))

    # all task heads in one (H, 7) matmul
    logits = jnp.dot(pooled, pool_head_w[:, HIDDEN:],
                     preferred_element_type=jnp.float32) \
        + misc_vec(GROW_HEAD_B, NUM_HEAD_OUT)

    sst = logits[:, :NUM_LABELS]
    sst = sst - jnp.max(sst, axis=-1, keepdims=True)
    e = jnp.exp(sst)
    sst = e * pl.reciprocal(jnp.sum(e, axis=-1, keepdims=True), approx=True)
    para = jax.nn.sigmoid(logits[:, NUM_LABELS:NUM_LABELS + 1])
    sts = jax.nn.sigmoid(logits[:, NUM_LABELS + 1:NUM_LABELS + 2]) * 5.0

    # ---- single lane-dense packed output block ----------------------------------
    out_ref[...] = jnp.zeros((batch, OUT_WIDTH), jnp.float32)
    out_ref[:, :HIDDEN] = pooled
    out_ref[:, HIDDEN:HIDDEN + NUM_LABELS] = sst
    out_ref[:, HIDDEN + NUM_LABELS:HIDDEN + NUM_LABELS + 1] = para
    out_ref[:, HIDDEN + NUM_LABELS + 1:HIDDEN + NUM_HEAD_OUT] = sts


# ------------------------------ wrappers / glue --------------------------------


@jax.jit
def _fused_forward(params, input_ids, attention_mask):
    """Runs the fused kernel; returns (pooled, sst_probs, para_prob, sts_score)."""
    b, s = input_ids.shape
    # embedding gathers stay in JAX glue (data-dependent gather)
    we = params["word_emb"][input_ids]                     # (B, S, H)
    pe = params["pos_emb"][:s][None, :, :]                 # (1, S, H)
    te = params["type_emb"][0][None, None, :]              # (1, 1, H)
    x = (we + pe + te).astype(jnp.float32)                 # (B, S, H)

    mask_bias = (1.0 - attention_mask.astype(jnp.float32)) * -10000.0   # (B, S)

    # batch tiling: shards across TensorCores (v7x) once the batch is large.
    bt = 8 if (b % 8 == 0) else b
    grid = (b // bt,)
    L = NUM_LAYERS

    kern = functools.partial(_fused_bert_kernel, batch=bt, seq=s)
    out = pl.pallas_call(
        kern,
        out_shape=jax.ShapeDtypeStruct((b, OUT_WIDTH), jnp.float32),
        grid=grid,
        in_specs=[
            pl.BlockSpec((bt, s, HIDDEN), lambda i: (i, 0, 0)),       # x
            pl.BlockSpec((bt, s), lambda i: (i, 0)),                  # mask bias
            pl.BlockSpec((MISC_ROWS, LANES), lambda i: (0, 0)),       # misc slab
            pl.BlockSpec((L, 8, LANES), lambda i: (0, 0, 0)),         # bias/LN slab
            pl.BlockSpec((L, W_SLAB_ROWS, LANES), lambda i: (0, 0, 0)),  # weights
        ],
        out_specs=pl.BlockSpec((bt, OUT_WIDTH), lambda i: (i, 0)),
        compiler_params=pltpu.CompilerParams(
            dimension_semantics=("parallel",)),
    )(x, mask_bias, params["misc"], params["lvec"], params["wslab"])

    pooled = out[:, :HIDDEN]
    sst_probs = out[:, HIDDEN:HIDDEN + NUM_LABELS]
    para_prob = out[:, HIDDEN + NUM_LABELS:HIDDEN + NUM_LABELS + 1]
    sts_score = out[:, HIDDEN + NUM_LABELS + 1:HIDDEN + NUM_HEAD_OUT]
    return pooled, sst_probs, para_prob, sts_score


def bert_forward(params, input_ids, attention_mask):
    """MultitaskBERT.forward: returns the pooler_output (B, H)."""
    pooled, _, _, _ = _fused_forward(params, input_ids, attention_mask)
    return pooled


def predict_sentiment(params, input_ids, attention_mask):
    # TODO(synk): nn.Dropout is identity at inference time; no stochastic dropout.
    _, sst_probs, _, _ = _fused_forward(params, input_ids, attention_mask)
    return sst_probs                                                   # (B, 5)


def predict_paraphrase(params, ids1, mask1, ids2, mask2):
    ids = jnp.concatenate((ids1, ids2), axis=-1)
    mask = jnp.concatenate((mask1, mask2), axis=-1)
    _, _, para_prob, _ = _fused_forward(params, ids, mask)
    return para_prob[:, 0]                                             # (B,)


def predict_similarity(params, ids1, mask1, ids2, mask2):
    ids = jnp.concatenate((ids1, ids2), axis=-1)
    mask = jnp.concatenate((mask1, mask2), axis=-1)
    _, _, _, sts_score = _fused_forward(params, ids, mask)
    return sts_score[:, 0]                                             # (B,)


# --------------------------- parameter init ------------------------------------


def init_params(key):
    keys = iter(jax.random.split(key, 12))

    def w(shape, scale=0.02):
        return jax.random.normal(next(keys), shape, jnp.float32) * scale

    L = NUM_LAYERS
    qkv_w = w((L, HIDDEN, 3 * HIDDEN))     # columns: [Q | K | V], head-chunked
    o_w = w((L, HIDDEN, HIDDEN))           # rows: head0 dims then head1 dims
    ff1_w = w((L, HIDDEN, INTERMEDIATE))
    ff2_w = w((L, INTERMEDIATE, HIDDEN))
    pool_w = w((HIDDEN, HIDDEN))
    head_w = w((HIDDEN, NUM_HEAD_OUT))     # cols [0:5]=sst, [5]=para, [6]=sts

    # bf16 per-layer weight slab (one prologue DMA for all matmul weights)
    wslab = jnp.zeros((L, W_SLAB_ROWS, LANES), jnp.float32)
    wslab = wslab.at[:, W_QKV_R0:W_QKV_R0 + HIDDEN, :3 * HIDDEN].set(qkv_w)
    wslab = wslab.at[:, W_O_R0:W_O_R0 + HIDDEN, :HIDDEN].set(o_w)
    wslab = wslab.at[:, W_FF1_R0:W_FF1_R0 + HIDDEN, :INTERMEDIATE].set(ff1_w)
    wslab = wslab.at[:, W_FF2_R0:W_FF2_R0 + INTERMEDIATE, :HIDDEN].set(ff2_w)
    wslab = wslab.astype(jnp.bfloat16)

    # f32 misc slab: emb-LN vecs, pooler/head biases, pooler+head weights
    misc = jnp.zeros((MISC_ROWS, LANES), jnp.float32)
    misc = misc.at[GROW_EMB_G, :HIDDEN].set(1.0)            # emb LN gamma
    # emb LN beta / pool_b / head_b stay zero at init
    misc = misc.at[POOLHEAD_R0:POOLHEAD_R0 + HIDDEN, :HIDDEN].set(pool_w)
    misc = misc.at[POOLHEAD_R0:POOLHEAD_R0 + HIDDEN,
                   HIDDEN:HIDDEN + NUM_HEAD_OUT].set(head_w)

    # f32 per-layer bias / LayerNorm slab
    lvec = jnp.zeros((L, 8, LANES), jnp.float32)
    lvec = lvec.at[:, ROW_LN1_G, :HIDDEN].set(1.0)
    lvec = lvec.at[:, ROW_LN2_G, :HIDDEN].set(1.0)
    # qkv_b / o_b / ff1_b / ff2_b / LN betas stay zero at init

    return {
        "word_emb": w((VOCAB, HIDDEN)),
        "pos_emb": w((MAX_POS, HIDDEN)),
        "type_emb": w((2, HIDDEN)),
        "misc": misc,
        "lvec": lvec,
        "wslab": wslab,
    }


# ------------------------------- main -------------------------------------------

if __name__ == "__main__":
    key = jax.random.PRNGKey(0)
    kp, k1, k2 = jax.random.split(key, 3)
    params = init_params(kp)

    B, S = 2, 8
    input_ids_1 = jax.random.randint(k1, (B, S), 0, VOCAB, dtype=jnp.int32)
    input_ids_2 = jax.random.randint(k2, (B, S), 0, VOCAB, dtype=jnp.int32)
    attention_mask_1 = jnp.ones((B, S), jnp.float32).at[1, S - 2:].set(0.0)
    attention_mask_2 = jnp.ones((B, S), jnp.float32).at[0, S - 1:].set(0.0)

    pooled = bert_forward(params, input_ids_1, attention_mask_1)          # (B, H)
    sst_probs = predict_sentiment(params, input_ids_1, attention_mask_1)  # (B, 5)
    para_probs = predict_paraphrase(params, input_ids_1, attention_mask_1,
                                    input_ids_2, attention_mask_2)        # (B,)
    sts_scores = predict_similarity(params, input_ids_1, attention_mask_1,
                                    input_ids_2, attention_mask_2)        # (B,)

    jax.block_until_ready((pooled, sst_probs, para_probs, sts_scores))

    assert pooled.shape == (B, HIDDEN)
    assert sst_probs.shape == (B, NUM_LABELS)
    assert para_probs.shape == (B,)
    assert sts_scores.shape == (B,)
    # sanity: sentiment probabilities normalize (approx reciprocal -> loose tol)
    assert bool(jnp.all(jnp.abs(jnp.sum(sst_probs, axis=-1) - 1.0) < 1e-2))
    assert bool(jnp.all((para_probs >= 0.0) & (para_probs <= 1.0)))
    assert bool(jnp.all((sts_scores >= 0.0) & (sts_scores <= 5.0)))

    print("KERNEL_OK")
</pallas_src>

<mosaic_0001>
module attributes {stable_mosaic.version = 11 : i64} {
  func.func @_fused_bert_kernel(%arg0: i32, %arg1: memref<2x8x32xf32, #tpu.memory_space<vmem>>, %arg2: memref<2x8xf32, #tpu.memory_space<vmem>>, %arg3: memref<40x128xf32, #tpu.memory_space<vmem>>, %arg4: memref<2x8x128xf32, #tpu.memory_space<vmem>>, %arg5: memref<2x160x128xbf16, #tpu.memory_space<vmem>>, %arg6: memref<2x128xf32, #tpu.memory_space<vmem>>) attributes {dimension_semantics = [#tpu.dimension_semantics<parallel>], iteration_bounds = array<i64: 1>, scalar_prefetch = 0 : i64, scratch_operands = 0 : i64, tpu.core_type = #tpu.core_type<tc>, window_params = [{transform_indices = @transform_0, window_bounds = array<i64: 2, 8, 32>}, {transform_indices = @transform_1, window_bounds = array<i64: 2, 8>}, {pipeline_mode = #tpu.pipeline_mode<synchronous>, transform_indices = @transform_2, window_bounds = array<i64: 40, 128>}, {pipeline_mode = #tpu.pipeline_mode<synchronous>, transform_indices = @transform_3, window_bounds = array<i64: 2, 8, 128>}, {pipeline_mode = #tpu.pipeline_mode<synchronous>, transform_indices = @transform_4, window_bounds = array<i64: 2, 160, 128>}, {transform_indices = @transform_5, window_bounds = array<i64: 2, 128>}]} {
    %c0 = arith.constant 0 : index
    %c0_0 = arith.constant 0 : index
    %c0_1 = arith.constant 0 : index
    %0 = vector.load %arg1[%c0, %c0_0, %c0_1] : memref<2x8x32xf32, #tpu.memory_space<vmem>>, vector<2x8x32xf32>
    %1 = vector.shape_cast %0 : vector<2x8x32xf32> to vector<16x32xf32>
    %c0_2 = arith.constant 0 : index
    %c0_3 = arith.constant 0 : index
    %2 = vector.load %arg3[%c0_2, %c0_3] : memref<40x128xf32, #tpu.memory_space<vmem>>, vector<1x32xf32>
    %c1 = arith.constant 1 : index
    %c0_4 = arith.constant 0 : index
    %3 = vector.load %arg3[%c1, %c0_4] : memref<40x128xf32, #tpu.memory_space<vmem>>, vector<1x32xf32>
    %cst = arith.constant dense<0.000000e+00> : vector<16xf32>
    %4 = vector.multi_reduction <add>, %1, %cst [1] : vector<16x32xf32> to vector<16xf32>
    %5 = vector.shape_cast %4 : vector<16xf32> to vector<16x1xf32>
    %cst_5 = arith.constant 3.200000e+01 : f32
    %6 = vector.broadcast %cst_5 : f32 to vector<16x1xf32>
    %7 = arith.divf %5, %6 : vector<16x1xf32>
    %8 = vector.broadcast %7 : vector<16x1xf32> to vector<16x32xf32>
    %9 = arith.subf %1, %8 : vector<16x32xf32>
    %10 = arith.mulf %9, %9 : vector<16x32xf32>
    %cst_6 = arith.constant dense<0.000000e+00> : vector<16xf32>
    %11 = vector.multi_reduction <add>, %10, %cst_6 [1] : vector<16x32xf32> to vector<16xf32>
    %12 = vector.shape_cast %11 : vector<16xf32> to vector<16x1xf32>
    %cst_7 = arith.constant 3.200000e+01 : f32
    %13 = vector.broadcast %cst_7 : f32 to vector<16x1xf32>
    %14 = arith.divf %12, %13 : vector<16x1xf32>
    %15 = vector.broadcast %7 : vector<16x1xf32> to vector<16x32xf32>
    %16 = arith.subf %1, %15 : vector<16x32xf32>
    %cst_8 = arith.constant 9.99999996E-13 : f32
    %17 = vector.broadcast %cst_8 : f32 to vector<16x1xf32>
    %18 = arith.addf %14, %17 : vector<16x1xf32>
    %19 = math.rsqrt %18 : vector<16x1xf32>
    %20 = vector.broadcast %19 : vector<16x1xf32> to vector<16x32xf32>
    %21 = arith.mulf %16, %20 : vector<16x32xf32>
    %22 = vector.broadcast %2 : vector<1x32xf32> to vector<16x32xf32>
    %23 = arith.mulf %21, %22 : vector<16x32xf32>
    %24 = vector.broadcast %3 : vector<1x32xf32> to vector<16x32xf32>
    %25 = arith.addf %23, %24 : vector<16x32xf32>
    %c0_9 = arith.constant 0 : index
    %c0_10 = arith.constant 0 : index
    %26 = vector.load %arg2[%c0_9, %c0_10] : memref<2x8xf32, #tpu.memory_space<vmem>>, vector<2x8xf32>
    %27 = vector.shape_cast %26 : vector<2x8xf32> to vector<2x1x8xf32>
    %28 = vector.shape_cast %27 : vector<2x1x8xf32> to vector<2x1x8xf32>
    %29 = vector.broadcast %28 : vector<2x1x8xf32> to vector<2x8x8xf32>
    %30 = arith.truncf %25 : vector<16x32xf32> to vector<16x32xbf16>
    %c0_11 = arith.constant 0 : index
    %c0_12 = arith.constant 0 : index
    %c0_13 = arith.constant 0 : index
    %31 = vector.load %arg5[%c0_11, %c0_12, %c0_13] : memref<2x160x128xbf16, #tpu.memory_space<vmem>>, vector<1x32x96xbf16>
    %32 = vector.shape_cast %31 : vector<1x32x96xbf16> to vector<32x96xbf16>
    %cst_14 = arith.constant dense<0.000000e+00> : vector<16x96xf32>
    %33 = tpu.matmul %30, %32, %cst_14 {dimension_numbers = #tpu.dot_dimension_numbers<[1], [0], [0], [1], [0, 0, 1, 1], [], []>} : vector<16x32xbf16>, vector<32x96xbf16>, vector<16x96xf32> -> vector<16x96xf32>
    %c0_15 = arith.constant 0 : index
    %c0_16 = arith.constant 0 : index
    %c0_17 = arith.constant 0 : index
    %34 = vector.load %arg4[%c0_15, %c0_16, %c0_17] : memref<2x8x128xf32, #tpu.memory_space<vmem>>, vector<1x1x96xf32>
    %35 = vector.shape_cast %34 : vector<1x1x96xf32> to vector<1x96xf32>
    %36 = vector.broadcast %35 : vector<1x96xf32> to vector<16x96xf32>
    %37 = arith.addf %33, %36 : vector<16x96xf32>
    %38 = vector.shape_cast %37 : vector<16x96xf32> to vector<2x8x96xf32>
    %39 = arith.truncf %38 : vector<2x8x96xf32> to vector<2x8x96xbf16>
    %40 = vector.extract_strided_slice %39 {offsets = [0, 0, 0], sizes = [2, 8, 16], strides = [1, 1, 1]} : vector<2x8x96xbf16> to vector<2x8x16xbf16>
    %41 = vector.extract_strided_slice %39 {offsets = [0, 0, 32], sizes = [2, 8, 16], strides = [1, 1, 1]} : vector<2x8x96xbf16> to vector<2x8x16xbf16>
    %42 = vector.extract_strided_slice %39 {offsets = [0, 0, 64], sizes = [2, 8, 16], strides = [1, 1, 1]} : vector<2x8x96xbf16> to vector<2x8x16xbf16>
    "tpu.trace_start"() <{level = 10 : i32, message = "bqd,bkd->bqk"}> : () -> ()
    %cst_18 = arith.constant dense<0.000000e+00> : vector<2x8x8xf32>
    %43 = tpu.matmul %40, %41, %cst_18 {dimension_numbers = #tpu.dot_dimension_numbers<[2], [2], [1], [1], [0, 0, 0, 1, 1, 1], [0], [0]>} : vector<2x8x16xbf16>, vector<2x8x16xbf16>, vector<2x8x8xf32> -> vector<2x8x8xf32>
    "tpu.trace_stop"() : () -> ()
    %cst_19 = arith.constant 2.500000e-01 : f32
    %44 = vector.broadcast %cst_19 : f32 to vector<2x8x8xf32>
    %45 = arith.mulf %43, %44 : vector<2x8x8xf32>
    %46 = arith.addf %45, %29 : vector<2x8x8xf32>
    %cst_20 = arith.constant dense<0xFF800000> : vector<2x8xf32>
    %47 = vector.multi_reduction <maximumf>, %46, %cst_20 [2] : vector<2x8x8xf32> to vector<2x8xf32>
    %48 = vector.shape_cast %47 : vector<2x8xf32> to vector<2x8x1xf32>
    %49 = vector.broadcast %48 : vector<2x8x1xf32> to vector<2x8x8xf32>
    %50 = arith.subf %46, %49 : vector<2x8x8xf32>
    %51 = math.exp %50 : vector<2x8x8xf32>
    %cst_21 = arith.constant dense<0.000000e+00> : vector<2x8xf32>
    %52 = vector.multi_reduction <add>, %51, %cst_21 [2] : vector<2x8x8xf32> to vector<2x8xf32>
    %53 = vector.shape_cast %52 : vector<2x8xf32> to vector<2x8x1xf32>
    %54 = vector.broadcast %53 : vector<2x8x1xf32> to vector<2x8x8xf32>
    %55 = arith.divf %51, %54 : vector<2x8x8xf32>
    %56 = arith.truncf %55 : vector<2x8x8xf32> to vector<2x8x8xbf16>
    "tpu.trace_start"() <{level = 10 : i32, message = "bqk,bkd->bqd"}> : () -> ()
    %cst_22 = arith.constant dense<0.000000e+00> : vector<2x8x16xf32>
    %57 = tpu.matmul %56, %42, %cst_22 {dimension_numbers = #tpu.dot_dimension_numbers<[2], [1], [1], [2], [0, 0, 0, 1, 1, 2], [0], [0]>} : vector<2x8x8xbf16>, vector<2x8x16xbf16>, vector<2x8x16xf32> -> vector<2x8x16xf32>
    "tpu.trace_stop"() : () -> ()
    %58 = vector.shape_cast %57 : vector<2x8x16xf32> to vector<16x16xf32>
    %59 = vector.extract_strided_slice %39 {offsets = [0, 0, 16], sizes = [2, 8, 16], strides = [1, 1, 1]} : vector<2x8x96xbf16> to vector<2x8x16xbf16>
    %60 = vector.extract_strided_slice %39 {offsets = [0, 0, 48], sizes = [2, 8, 16], strides = [1, 1, 1]} : vector<2x8x96xbf16> to vector<2x8x16xbf16>
    %61 = vector.extract_strided_slice %39 {offsets = [0, 0, 80], sizes = [2, 8, 16], strides = [1, 1, 1]} : vector<2x8x96xbf16> to vector<2x8x16xbf16>
    "tpu.trace_start"() <{level = 10 : i32, message = "bqd,bkd->bqk"}> : () -> ()
    %cst_23 = arith.constant dense<0.000000e+00> : vector<2x8x8xf32>
    %62 = tpu.matmul %59, %60, %cst_23 {dimension_numbers = #tpu.dot_dimension_numbers<[2], [2], [1], [1], [0, 0, 0, 1, 1, 1], [0], [0]>} : vector<2x8x16xbf16>, vector<2x8x16xbf16>, vector<2x8x8xf32> -> vector<2x8x8xf32>
    "tpu.trace_stop"() : () -> ()
    %cst_24 = arith.constant 2.500000e-01 : f32
    %63 = vector.broadcast %cst_24 : f32 to vector<2x8x8xf32>
    %64 = arith.mulf %62, %63 : vector<2x8x8xf32>
    %65 = arith.addf %64, %29 : vector<2x8x8xf32>
    %cst_25 = arith.constant dense<0xFF800000> : vector<2x8xf32>
    %66 = vector.multi_reduction <maximumf>, %65, %cst_25 [2] : vector<2x8x8xf32> to vector<2x8xf32>
    %67 = vector.shape_cast %66 : vector<2x8xf32> to vector<2x8x1xf32>
    %68 = vector.broadcast %67 : vector<2x8x1xf32> to vector<2x8x8xf32>
    %69 = arith.subf %65, %68 : vector<2x8x8xf32>
    %70 = math.exp %69 : vector<2x8x8xf32>
    %cst_26 = arith.constant dense<0.000000e+00> : vector<2x8xf32>
    %71 = vector.multi_reduction <add>, %70, %cst_26 [2] : vector<2x8x8xf32> to vector<2x8xf32>
    %72 = vector.shape_cast %71 : vector<2x8xf32> to vector<2x8x1xf32>
    %73 = vector.broadcast %72 : vector<2x8x1xf32> to vector<2x8x8xf32>
    %74 = arith.divf %70, %73 : vector<2x8x8xf32>
    %75 = arith.truncf %74 : vector<2x8x8xf32> to vector<2x8x8xbf16>
    "tpu.trace_start"() <{level = 10 : i32, message = "bqk,bkd->bqd"}> : () -> ()
    %cst_27 = arith.constant dense<0.000000e+00> : vector<2x8x16xf32>
    %76 = tpu.matmul %75, %61, %cst_27 {dimension_numbers = #tpu.dot_dimension_numbers<[2], [1], [1], [2], [0, 0, 0, 1, 1, 2], [0], [0]>} : vector<2x8x8xbf16>, vector<2x8x16xbf16>, vector<2x8x16xf32> -> vector<2x8x16xf32>
    "tpu.trace_stop"() : () -> ()
    %77 = vector.shape_cast %76 : vector<2x8x16xf32> to vector<16x16xf32>
    %78 = tpu.concatenate %58, %77 in 1 : vector<16x16xf32>, vector<16x16xf32> -> vector<16x32xf32>
    %79 = arith.truncf %78 : vector<16x32xf32> to vector<16x32xbf16>
    %c0_28 = arith.constant 0 : index
    %c32 = arith.constant 32 : index
    %c0_29 = arith.constant 0 : index
    %80 = vector.load %arg5[%c0_28, %c32, %c0_29] : memref<2x160x128xbf16, #tpu.memory_space<vmem>>, vector<1x32x32xbf16>
    %81 = vector.shape_cast %80 : vector<1x32x32xbf16> to vector<32x32xbf16>
    %cst_30 = arith.constant dense<0.000000e+00> : vector<16x32xf32>
    %82 = tpu.matmul %79, %81, %cst_30 {dimension_numbers = #tpu.dot_dimension_numbers<[1], [0], [0], [1], [0, 0, 1, 1], [], []>} : vector<16x32xbf16>, vector<32x32xbf16>, vector<16x32xf32> -> vector<16x32xf32>
    %c0_31 = arith.constant 0 : index
    %c1_32 = arith.constant 1 : index
    %c0_33 = arith.constant 0 : index
    %83 = vector.load %arg4[%c0_31, %c1_32, %c0_33] : memref<2x8x128xf32, #tpu.memory_space<vmem>>, vector<1x1x32xf32>
    %84 = vector.shape_cast %83 : vector<1x1x32xf32> to vector<1x32xf32>
    %85 = vector.broadcast %84 : vector<1x32xf32> to vector<16x32xf32>
    %86 = arith.addf %82, %85 : vector<16x32xf32>
    %87 = arith.addf %25, %86 : vector<16x32xf32>
    %c0_34 = arith.constant 0 : index
    %c2 = arith.constant 2 : index
    %c0_35 = arith.constant 0 : index
    %88 = vector.load %arg4[%c0_34, %c2, %c0_35] : memref<2x8x128xf32, #tpu.memory_space<vmem>>, vector<1x1x32xf32>
    %89 = vector.shape_cast %88 : vector<1x1x32xf32> to vector<1x32xf32>
    %c0_36 = arith.constant 0 : index
    %c3 = arith.constant 3 : index
    %c0_37 = arith.constant 0 : index
    %90 = vector.load %arg4[%c0_36, %c3, %c0_37] : memref<2x8x128xf32, #tpu.memory_space<vmem>>, vector<1x1x32xf32>
    %91 = vector.shape_cast %90 : vector<1x1x32xf32> to vector<1x32xf32>
    %cst_38 = arith.constant dense<0.000000e+00> : vector<16xf32>
    %92 = vector.multi_reduction <add>, %87, %cst_38 [1] : vector<16x32xf32> to vector<16xf32>
    %93 = vector.shape_cast %92 : vector<16xf32> to vector<16x1xf32>
    %cst_39 = arith.constant 3.200000e+01 : f32
    %94 = vector.broadcast %cst_39 : f32 to vector<16x1xf32>
    %95 = arith.divf %93, %94 : vector<16x1xf32>
    %96 = vector.broadcast %95 : vector<16x1xf32> to vector<16x32xf32>
    %97 = arith.subf %87, %96 : vector<16x32xf32>
    %98 = arith.mulf %97, %97 : vector<16x32xf32>
    %cst_40 = arith.constant dense<0.000000e+00> : vector<16xf32>
    %99 = vector.multi_reduction <add>, %98, %cst_40 [1] : vector<16x32xf32> to vector<16xf32>
    %100 = vector.shape_cast %99 : vector<16xf32> to vector<16x1xf32>
    %cst_41 = arith.constant 3.200000e+01 : f32
    %101 = vector.broadcast %cst_41 : f32 to vector<16x1xf32>
    %102 = arith.divf %100, %101 : vector<16x1xf32>
    %103 = vector.broadcast %95 : vector<16x1xf32> to vector<16x32xf32>
    %104 = arith.subf %87, %103 : vector<16x32xf32>
    %cst_42 = arith.constant 9.99999996E-13 : f32
    %105 = vector.broadcast %cst_42 : f32 to vector<16x1xf32>
    %106 = arith.addf %102, %105 : vector<16x1xf32>
    %107 = math.rsqrt %106 : vector<16x1xf32>
    %108 = vector.broadcast %107 : vector<16x1xf32> to vector<16x32xf32>
    %109 = arith.mulf %104, %108 : vector<16x32xf32>
    %110 = vector.broadcast %89 : vector<1x32xf32> to vector<16x32xf32>
    %111 = arith.mulf %109, %110 : vector<16x32xf32>
    %112 = vector.broadcast %91 : vector<1x32xf32> to vector<16x32xf32>
    %113 = arith.addf %111, %112 : vector<16x32xf32>
    %114 = arith.truncf %113 : vector<16x32xf32> to vector<16x32xbf16>
    %c0_43 = arith.constant 0 : index
    %c64 = arith.constant 64 : index
    %c0_44 = arith.constant 0 : index
    %115 = vector.load %arg5[%c0_43, %c64, %c0_44] : memref<2x160x128xbf16, #tpu.memory_space<vmem>>, vector<1x32x64xbf16>
    %116 = vector.shape_cast %115 : vector<1x32x64xbf16> to vector<32x64xbf16>
    %cst_45 = arith.constant dense<0.000000e+00> : vector<16x64xf32>
    %117 = tpu.matmul %114, %116, %cst_45 {dimension_numbers = #tpu.dot_dimension_numbers<[1], [0], [0], [1], [0, 0, 1, 1], [], []>} : vector<16x32xbf16>, vector<32x64xbf16>, vector<16x64xf32> -> vector<16x64xf32>
    %c0_46 = arith.constant 0 : index
    %c4 = arith.constant 4 : index
    %c0_47 = arith.constant 0 : index
    %118 = vector.load %arg4[%c0_46, %c4, %c0_47] : memref<2x8x128xf32, #tpu.memory_space<vmem>>, vector<1x1x64xf32>
    %119 = vector.shape_cast %118 : vector<1x1x64xf32> to vector<1x64xf32>
    %120 = vector.broadcast %119 : vector<1x64xf32> to vector<16x64xf32>
    %121 = arith.addf %117, %120 : vector<16x64xf32>
    %122 = arith.mulf %121, %121 : vector<16x64xf32>
    %123 = arith.mulf %121, %122 : vector<16x64xf32>
    %cst_48 = arith.constant 4.471500e-02 : f32
    %124 = vector.broadcast %cst_48 : f32 to vector<16x64xf32>
    %125 = arith.mulf %124, %123 : vector<16x64xf32>
    %126 = arith.addf %121, %125 : vector<16x64xf32>
    %cst_49 = arith.constant 0.797884583 : f32
    %127 = vector.broadcast %cst_49 : f32 to vector<16x64xf32>
    %128 = arith.mulf %127, %126 : vector<16x64xf32>
    %129 = math.tanh %128 : vector<16x64xf32>
    %cst_50 = arith.constant 1.000000e+00 : f32
    %130 = vector.broadcast %cst_50 : f32 to vector<16x64xf32>
    %131 = arith.addf %130, %129 : vector<16x64xf32>
    %cst_51 = arith.constant 5.000000e-01 : f32
    %132 = vector.broadcast %cst_51 : f32 to vector<16x64xf32>
    %133 = arith.mulf %132, %131 : vector<16x64xf32>
    %134 = arith.mulf %121, %133 : vector<16x64xf32>
    %135 = arith.truncf %134 : vector<16x64xf32> to vector<16x64xbf16>
    %c0_52 = arith.constant 0 : index
    %c96 = arith.constant 96 : index
    %c0_53 = arith.constant 0 : index
    %136 = vector.load %arg5[%c0_52, %c96, %c0_53] : memref<2x160x128xbf16, #tpu.memory_space<vmem>>, vector<1x64x32xbf16>
    %137 = vector.shape_cast %136 : vector<1x64x32xbf16> to vector<64x32xbf16>
    %cst_54 = arith.constant dense<0.000000e+00> : vector<16x32xf32>
    %138 = tpu.matmul %135, %137, %cst_54 {dimension_numbers = #tpu.dot_dimension_numbers<[1], [0], [0], [1], [0, 0, 1, 1], [], []>} : vector<16x64xbf16>, vector<64x32xbf16>, vector<16x32xf32> -> vector<16x32xf32>
    %c0_55 = arith.constant 0 : index
    %c5 = arith.constant 5 : index
    %c0_56 = arith.constant 0 : index
    %139 = vector.load %arg4[%c0_55, %c5, %c0_56] : memref<2x8x128xf32, #tpu.memory_space<vmem>>, vector<1x1x32xf32>
    %140 = vector.shape_cast %139 : vector<1x1x32xf32> to vector<1x32xf32>
    %141 = vector.broadcast %140 : vector<1x32xf32> to vector<16x32xf32>
    %142 = arith.addf %138, %141 : vector<16x32xf32>
    %143 = arith.addf %113, %142 : vector<16x32xf32>
    %c0_57 = arith.constant 0 : index
    %c6 = arith.constant 6 : index
    %c0_58 = arith.constant 0 : index
    %144 = vector.load %arg4[%c0_57, %c6, %c0_58] : memref<2x8x128xf32, #tpu.memory_space<vmem>>, vector<1x1x32xf32>
    %145 = vector.shape_cast %144 : vector<1x1x32xf32> to vector<1x32xf32>
    %c0_59 = arith.constant 0 : index
    %c7 = arith.constant 7 : index
    %c0_60 = arith.constant 0 : index
    %146 = vector.load %arg4[%c0_59, %c7, %c0_60] : memref<2x8x128xf32, #tpu.memory_space<vmem>>, vector<1x1x32xf32>
    %147 = vector.shape_cast %146 : vector<1x1x32xf32> to vector<1x32xf32>
    %cst_61 = arith.constant dense<0.000000e+00> : vector<16xf32>
    %148 = vector.multi_reduction <add>, %143, %cst_61 [1] : vector<16x32xf32> to vector<16xf32>
    %149 = vector.shape_cast %148 : vector<16xf32> to vector<16x1xf32>
    %cst_62 = arith.constant 3.200000e+01 : f32
    %150 = vector.broadcast %cst_62 : f32 to vector<16x1xf32>
    %151 = arith.divf %149, %150 : vector<16x1xf32>
    %152 = vector.broadcast %151 : vector<16x1xf32> to vector<16x32xf32>
    %153 = arith.subf %143, %152 : vector<16x32xf32>
    %154 = arith.mulf %153, %153 : vector<16x32xf32>
    %cst_63 = arith.constant dense<0.000000e+00> : vector<16xf32>
    %155 = vector.multi_reduction <add>, %154, %cst_63 [1] : vector<16x32xf32> to vector<16xf32>
    %156 = vector.shape_cast %155 : vector<16xf32> to vector<16x1xf32>
    %cst_64 = arith.constant 3.200000e+01 : f32
    %157 = vector.broadcast %cst_64 : f32 to vector<16x1xf32>
    %158 = arith.divf %156, %157 : vector<16x1xf32>
    %159 = vector.broadcast %151 : vector<16x1xf32> to vector<16x32xf32>
    %160 = arith.subf %143, %159 : vector<16x32xf32>
    %cst_65 = arith.constant 9.99999996E-13 : f32
    %161 = vector.broadcast %cst_65 : f32 to vector<16x1xf32>
    %162 = arith.addf %158, %161 : vector<16x1xf32>
    %163 = math.rsqrt %162 : vector<16x1xf32>
    %164 = vector.broadcast %163 : vector<16x1xf32> to vector<16x32xf32>
    %165 = arith.mulf %160, %164 : vector<16x32xf32>
    %166 = vector.broadcast %145 : vector<1x32xf32> to vector<16x32xf32>
    %167 = arith.mulf %165, %166 : vector<16x32xf32>
    %168 = vector.broadcast %147 : vector<1x32xf32> to vector<16x32xf32>
    %169 = arith.addf %167, %168 : vector<16x32xf32>
    %170 = arith.truncf %169 : vector<16x32xf32> to vector<16x32xbf16>
    %c1_66 = arith.constant 1 : index
    %c0_67 = arith.constant 0 : index
    %c0_68 = arith.constant 0 : index
    %171 = vector.load %arg5[%c1_66, %c0_67, %c0_68] : memref<2x160x128xbf16, #tpu.memory_space<vmem>>, vector<1x32x96xbf16>
    %172 = vector.shape_cast %171 : vector<1x32x96xbf16> to vector<32x96xbf16>
    %cst_69 = arith.constant dense<0.000000e+00> : vector<16x96xf32>
    %173 = tpu.matmul %170, %172, %cst_69 {dimension_numbers = #tpu.dot_dimension_numbers<[1], [0], [0], [1], [0, 0, 1, 1], [], []>} : vector<16x32xbf16>, vector<32x96xbf16>, vector<16x96xf32> -> vector<16x96xf32>
    %c1_70 = arith.constant 1 : index
    %c0_71 = arith.constant 0 : index
    %c0_72 = arith.constant 0 : index
    %174 = vector.load %arg4[%c1_70, %c0_71, %c0_72] : memref<2x8x128xf32, #tpu.memory_space<vmem>>, vector<1x1x96xf32>
    %175 = vector.shape_cast %174 : vector<1x1x96xf32> to vector<1x96xf32>
    %176 = vector.broadcast %175 : vector<1x96xf32> to vector<16x96xf32>
    %177 = arith.addf %173, %176 : vector<16x96xf32>
    %178 = vector.shape_cast %177 : vector<16x96xf32> to vector<2x8x96xf32>
    %179 = arith.truncf %178 : vector<2x8x96xf32> to vector<2x8x96xbf16>
    %180 = vector.extract_strided_slice %179 {offsets = [0, 0, 0], sizes = [2, 8, 16], strides = [1, 1, 1]} : vector<2x8x96xbf16> to vector<2x8x16xbf16>
    %181 = vector.extract_strided_slice %179 {offsets = [0, 0, 32], sizes = [2, 8, 16], strides = [1, 1, 1]} : vector<2x8x96xbf16> to vector<2x8x16xbf16>
    %182 = vector.extract_strided_slice %179 {offsets = [0, 0, 64], sizes = [2, 8, 16], strides = [1, 1, 1]} : vector<2x8x96xbf16> to vector<2x8x16xbf16>
    "tpu.trace_start"() <{level = 10 : i32, message = "bqd,bkd->bqk"}> : () -> ()
    %cst_73 = arith.constant dense<0.000000e+00> : vector<2x8x8xf32>
    %183 = tpu.matmul %180, %181, %cst_73 {dimension_numbers = #tpu.dot_dimension_numbers<[2], [2], [1], [1], [0, 0, 0, 1, 1, 1], [0], [0]>} : vector<2x8x16xbf16>, vector<2x8x16xbf16>, vector<2x8x8xf32> -> vector<2x8x8xf32>
    "tpu.trace_stop"() : () -> ()
    %cst_74 = arith.constant 2.500000e-01 : f32
    %184 = vector.broadcast %cst_74 : f32 to vector<2x8x8xf32>
    %185 = arith.mulf %183, %184 : vector<2x8x8xf32>
    %186 = arith.addf %185, %29 : vector<2x8x8xf32>
    %cst_75 = arith.constant dense<0xFF800000> : vector<2x8xf32>
    %187 = vector.multi_reduction <maximumf>, %186, %cst_75 [2] : vector<2x8x8xf32> to vector<2x8xf32>
    %188 = vector.shape_cast %187 : vector<2x8xf32> to vector<2x8x1xf32>
    %189 = vector.broadcast %188 : vector<2x8x1xf32> to vector<2x8x8xf32>
    %190 = arith.subf %186, %189 : vector<2x8x8xf32>
    %191 = math.exp %190 : vector<2x8x8xf32>
    %cst_76 = arith.constant dense<0.000000e+00> : vector<2x8xf32>
    %192 = vector.multi_reduction <add>, %191, %cst_76 [2] : vector<2x8x8xf32> to vector<2x8xf32>
    %193 = vector.shape_cast %192 : vector<2x8xf32> to vector<2x8x1xf32>
    %194 = vector.broadcast %193 : vector<2x8x1xf32> to vector<2x8x8xf32>
    %195 = arith.divf %191, %194 : vector<2x8x8xf32>
    %196 = arith.truncf %195 : vector<2x8x8xf32> to vector<2x8x8xbf16>
    "tpu.trace_start"() <{level = 10 : i32, message = "bqk,bkd->bqd"}> : () -> ()
    %cst_77 = arith.constant dense<0.000000e+00> : vector<2x8x16xf32>
    %197 = tpu.matmul %196, %182, %cst_77 {dimension_numbers = #tpu.dot_dimension_numbers<[2], [1], [1], [2], [0, 0, 0, 1, 1, 2], [0], [0]>} : vector<2x8x8xbf16>, vector<2x8x16xbf16>, vector<2x8x16xf32> -> vector<2x8x16xf32>
    "tpu.trace_stop"() : () -> ()
    %198 = vector.shape_cast %197 : vector<2x8x16xf32> to vector<16x16xf32>
    %199 = vector.extract_strided_slice %179 {offsets = [0, 0, 16], sizes = [2, 8, 16], strides = [1, 1, 1]} : vector<2x8x96xbf16> to vector<2x8x16xbf16>
    %200 = vector.extract_strided_slice %179 {offsets = [0, 0, 48], sizes = [2, 8, 16], strides = [1, 1, 1]} : vector<2x8x96xbf16> to vector<2x8x16xbf16>
    %201 = vector.extract_strided_slice %179 {offsets = [0, 0, 80], sizes = [2, 8, 16], strides = [1, 1, 1]} : vector<2x8x96xbf16> to vector<2x8x16xbf16>
    "tpu.trace_start"() <{level = 10 : i32, message = "bqd,bkd->bqk"}> : () -> ()
    %cst_78 = arith.constant dense<0.000000e+00> : vector<2x8x8xf32>
    %202 = tpu.matmul %199, %200, %cst_78 {dimension_numbers = #tpu.dot_dimension_numbers<[2], [2], [1], [1], [0, 0, 0, 1, 1, 1], [0], [0]>} : vector<2x8x16xbf16>, vector<2x8x16xbf16>, vector<2x8x8xf32> -> vector<2x8x8xf32>
    "tpu.trace_stop"() : () -> ()
    %cst_79 = arith.constant 2.500000e-01 : f32
    %203 = vector.broadcast %cst_79 : f32 to vector<2x8x8xf32>
    %204 = arith.mulf %202, %203 : vector<2x8x8xf32>
    %205 = arith.addf %204, %29 : vector<2x8x8xf32>
    %cst_80 = arith.constant dense<0xFF800000> : vector<2x8xf32>
    %206 = vector.multi_reduction <maximumf>, %205, %cst_80 [2] : vector<2x8x8xf32> to vector<2x8xf32>
    %207 = vector.shape_cast %206 : vector<2x8xf32> to vector<2x8x1xf32>
    %208 = vector.broadcast %207 : vector<2x8x1xf32> to vector<2x8x8xf32>
    %209 = arith.subf %205, %208 : vector<2x8x8xf32>
    %210 = math.exp %209 : vector<2x8x8xf32>
    %cst_81 = arith.constant dense<0.000000e+00> : vector<2x8xf32>
    %211 = vector.multi_reduction <add>, %210, %cst_81 [2] : vector<2x8x8xf32> to vector<2x8xf32>
    %212 = vector.shape_cast %211 : vector<2x8xf32> to vector<2x8x1xf32>
    %213 = vector.broadcast %212 : vector<2x8x1xf32> to vector<2x8x8xf32>
    %214 = arith.divf %210, %213 : vector<2x8x8xf32>
    %215 = arith.truncf %214 : vector<2x8x8xf32> to vector<2x8x8xbf16>
    "tpu.trace_start"() <{level = 10 : i32, message = "bqk,bkd->bqd"}> : () -> ()
    %cst_82 = arith.constant dense<0.000000e+00> : vector<2x8x16xf32>
    %216 = tpu.matmul %215, %201, %cst_82 {dimension_numbers = #tpu.dot_dimension_numbers<[2], [1], [1], [2], [0, 0, 0, 1, 1, 2], [0], [0]>} : vector<2x8x8xbf16>, vector<2x8x16xbf16>, vector<2x8x16xf32> -> vector<2x8x16xf32>
    "tpu.trace_stop"() : () -> ()
    %217 = vector.shape_cast %216 : vector<2x8x16xf32> to vector<16x16xf32>
    %218 = tpu.concatenate %198, %217 in 1 : vector<16x16xf32>, vector<16x16xf32> -> vector<16x32xf32>
    %219 = arith.truncf %218 : vector<16x32xf32> to vector<16x32xbf16>
    %c1_83 = arith.constant 1 : index
    %c32_84 = arith.constant 32 : index
    %c0_85 = arith.constant 0 : index
    %220 = vector.load %arg5[%c1_83, %c32_84, %c0_85] : memref<2x160x128xbf16, #tpu.memory_space<vmem>>, vector<1x32x32xbf16>
    %221 = vector.shape_cast %220 : vector<1x32x32xbf16> to vector<32x32xbf16>
    %cst_86 = arith.constant dense<0.000000e+00> : vector<16x32xf32>
    %222 = tpu.matmul %219, %221, %cst_86 {dimension_numbers = #tpu.dot_dimension_numbers<[1], [0], [0], [1], [0, 0, 1, 1], [], []>} : vector<16x32xbf16>, vector<32x32xbf16>, vector<16x32xf32> -> vector<16x32xf32>
    %c1_87 = arith.constant 1 : index
    %c1_88 = arith.constant 1 : index
    %c0_89 = arith.constant 0 : index
    %223 = vector.load %arg4[%c1_87, %c1_88, %c0_89] : memref<2x8x128xf32, #tpu.memory_space<vmem>>, vector<1x1x32xf32>
    %224 = vector.shape_cast %223 : vector<1x1x32xf32> to vector<1x32xf32>
    %225 = vector.broadcast %224 : vector<1x32xf32> to vector<16x32xf32>
    %226 = arith.addf %222, %225 : vector<16x32xf32>
    %227 = arith.addf %169, %226 : vector<16x32xf32>
    %c1_90 = arith.constant 1 : index
    %c2_91 = arith.constant 2 : index
    %c0_92 = arith.constant 0 : index
    %228 = vector.load %arg4[%c1_90, %c2_91, %c0_92] : memref<2x8x128xf32, #tpu.memory_space<vmem>>, vector<1x1x32xf32>
    %229 = vector.shape_cast %228 : vector<1x1x32xf32> to vector<1x32xf32>
    %c1_93 = arith.constant 1 : index
    %c3_94 = arith.constant 3 : index
    %c0_95 = arith.constant 0 : index
    %230 = vector.load %arg4[%c1_93, %c3_94, %c0_95] : memref<2x8x128xf32, #tpu.memory_space<vmem>>, vector<1x1x32xf32>
    %231 = vector.shape_cast %230 : vector<1x1x32xf32> to vector<1x32xf32>
    %cst_96 = arith.constant dense<0.000000e+00> : vector<16xf32>
    %232 = vector.multi_reduction <add>, %227, %cst_96 [1] : vector<16x32xf32> to vector<16xf32>
    %233 = vector.shape_cast %232 : vector<16xf32> to vector<16x1xf32>
    %cst_97 = arith.constant 3.200000e+01 : f32
    %234 = vector.broadcast %cst_97 : f32 to vector<16x1xf32>
    %235 = arith.divf %233, %234 : vector<16x1xf32>
    %236 = vector.broadcast %235 : vector<16x1xf32> to vector<16x32xf32>
    %237 = arith.subf %227, %236 : vector<16x32xf32>
    %238 = arith.mulf %237, %237 : vector<16x32xf32>
    %cst_98 = arith.constant dense<0.000000e+00> : vector<16xf32>
    %239 = vector.multi_reduction <add>, %238, %cst_98 [1] : vector<16x32xf32> to vector<16xf32>
    %240 = vector.shape_cast %239 : vector<16xf32> to vector<16x1xf32>
    %cst_99 = arith.constant 3.200000e+01 : f32
    %241 = vector.broadcast %cst_99 : f32 to vector<16x1xf32>
    %242 = arith.divf %240, %241 : vector<16x1xf32>
    %243 = vector.broadcast %235 : vector<16x1xf32> to vector<16x32xf32>
    %244 = arith.subf %227, %243 : vector<16x32xf32>
    %cst_100 = arith.constant 9.99999996E-13 : f32
    %245 = vector.broadcast %cst_100 : f32 to vector<16x1xf32>
    %246 = arith.addf %242, %245 : vector<16x1xf32>
    %247 = math.rsqrt %246 : vector<16x1xf32>
    %248 = vector.broadcast %247 : vector<16x1xf32> to vector<16x32xf32>
    %249 = arith.mulf %244, %248 : vector<16x32xf32>
    %250 = vector.broadcast %229 : vector<1x32xf32> to vector<16x32xf32>
    %251 = arith.mulf %249, %250 : vector<16x32xf32>
    %252 = vector.broadcast %231 : vector<1x32xf32> to vector<16x32xf32>
    %253 = arith.addf %251, %252 : vector<16x32xf32>
    %254 = arith.truncf %253 : vector<16x32xf32> to vector<16x32xbf16>
    %c1_101 = arith.constant 1 : index
    %c64_102 = arith.constant 64 : index
    %c0_103 = arith.constant 0 : index
    %255 = vector.load %arg5[%c1_101, %c64_102, %c0_103] : memref<2x160x128xbf16, #tpu.memory_space<vmem>>, vector<1x32x64xbf16>
    %256 = vector.shape_cast %255 : vector<1x32x64xbf16> to vector<32x64xbf16>
    %cst_104 = arith.constant dense<0.000000e+00> : vector<16x64xf32>
    %257 = tpu.matmul %254, %256, %cst_104 {dimension_numbers = #tpu.dot_dimension_numbers<[1], [0], [0], [1], [0, 0, 1, 1], [], []>} : vector<16x32xbf16>, vector<32x64xbf16>, vector<16x64xf32> -> vector<16x64xf32>
    %c1_105 = arith.constant 1 : index
    %c4_106 = arith.constant 4 : index
    %c0_107 = arith.constant 0 : index
    %258 = vector.load %arg4[%c1_105, %c4_106, %c0_107] : memref<2x8x128xf32, #tpu.memory_space<vmem>>, vector<1x1x64xf32>
    %259 = vector.shape_cast %258 : vector<1x1x64xf32> to vector<1x64xf32>
    %260 = vector.broadcast %259 : vector<1x64xf32> to vector<16x64xf32>
    %261 = arith.addf %257, %260 : vector<16x64xf32>
    %262 = arith.mulf %261, %261 : vector<16x64xf32>
    %263 = arith.mulf %261, %262 : vector<16x64xf32>
    %cst_108 = arith.constant 4.471500e-02 : f32
    %264 = vector.broadcast %cst_108 : f32 to vector<16x64xf32>
    %265 = arith.mulf %264, %263 : vector<16x64xf32>
    %266 = arith.addf %261, %265 : vector<16x64xf32>
    %cst_109 = arith.constant 0.797884583 : f32
    %267 = vector.broadcast %cst_109 : f32 to vector<16x64xf32>
    %268 = arith.mulf %267, %266 : vector<16x64xf32>
    %269 = math.tanh %268 : vector<16x64xf32>
    %cst_110 = arith.constant 1.000000e+00 : f32
    %270 = vector.broadcast %cst_110 : f32 to vector<16x64xf32>
    %271 = arith.addf %270, %269 : vector<16x64xf32>
    %cst_111 = arith.constant 5.000000e-01 : f32
    %272 = vector.broadcast %cst_111 : f32 to vector<16x64xf32>
    %273 = arith.mulf %272, %271 : vector<16x64xf32>
    %274 = arith.mulf %261, %273 : vector<16x64xf32>
    %275 = arith.truncf %274 : vector<16x64xf32> to vector<16x64xbf16>
    %c1_112 = arith.constant 1 : index
    %c96_113 = arith.constant 96 : index
    %c0_114 = arith.constant 0 : index
    %276 = vector.load %arg5[%c1_112, %c96_113, %c0_114] : memref<2x160x128xbf16, #tpu.memory_space<vmem>>, vector<1x64x32xbf16>
    %277 = vector.shape_cast %276 : vector<1x64x32xbf16> to vector<64x32xbf16>
    %cst_115 = arith.constant dense<0.000000e+00> : vector<16x32xf32>
    %278 = tpu.matmul %275, %277, %cst_115 {dimension_numbers = #tpu.dot_dimension_numbers<[1], [0], [0], [1], [0, 0, 1, 1], [], []>} : vector<16x64xbf16>, vector<64x32xbf16>, vector<16x32xf32> -> vector<16x32xf32>
    %c1_116 = arith.constant 1 : index
    %c5_117 = arith.constant 5 : index
    %c0_118 = arith.constant 0 : index
    %279 = vector.load %arg4[%c1_116, %c5_117, %c0_118] : memref<2x8x128xf32, #tpu.memory_space<vmem>>, vector<1x1x32xf32>
    %280 = vector.shape_cast %279 : vector<1x1x32xf32> to vector<1x32xf32>
    %281 = vector.broadcast %280 : vector<1x32xf32> to vector<16x32xf32>
    %282 = arith.addf %278, %281 : vector<16x32xf32>
    %283 = arith.addf %253, %282 : vector<16x32xf32>
    %c1_119 = arith.constant 1 : index
    %c6_120 = arith.constant 6 : index
    %c0_121 = arith.constant 0 : index
    %284 = vector.load %arg4[%c1_119, %c6_120, %c0_121] : memref<2x8x128xf32, #tpu.memory_space<vmem>>, vector<1x1x32xf32>
    %285 = vector.shape_cast %284 : vector<1x1x32xf32> to vector<1x32xf32>
    %c1_122 = arith.constant 1 : index
    %c7_123 = arith.constant 7 : index
    %c0_124 = arith.constant 0 : index
    %286 = vector.load %arg4[%c1_122, %c7_123, %c0_124] : memref<2x8x128xf32, #tpu.memory_space<vmem>>, vector<1x1x32xf32>
    %287 = vector.shape_cast %286 : vector<1x1x32xf32> to vector<1x32xf32>
    %cst_125 = arith.constant dense<0.000000e+00> : vector<16xf32>
    %288 = vector.multi_reduction <add>, %283, %cst_125 [1] : vector<16x32xf32> to vector<16xf32>
    %289 = vector.shape_cast %288 : vector<16xf32> to vector<16x1xf32>
    %cst_126 = arith.constant 3.200000e+01 : f32
    %290 = vector.broadcast %cst_126 : f32 to vector<16x1xf32>
    %291 = arith.divf %289, %290 : vector<16x1xf32>
    %292 = vector.broadcast %291 : vector<16x1xf32> to vector<16x32xf32>
    %293 = arith.subf %283, %292 : vector<16x32xf32>
    %294 = arith.mulf %293, %293 : vector<16x32xf32>
    %cst_127 = arith.constant dense<0.000000e+00> : vector<16xf32>
    %295 = vector.multi_reduction <add>, %294, %cst_127 [1] : vector<16x32xf32> to vector<16xf32>
    %296 = vector.shape_cast %295 : vector<16xf32> to vector<16x1xf32>
    %cst_128 = arith.constant 3.200000e+01 : f32
    %297 = vector.broadcast %cst_128 : f32 to vector<16x1xf32>
    %298 = arith.divf %296, %297 : vector<16x1xf32>
    %299 = vector.broadcast %291 : vector<16x1xf32> to vector<16x32xf32>
    %300 = arith.subf %283, %299 : vector<16x32xf32>
    %cst_129 = arith.constant 9.99999996E-13 : f32
    %301 = vector.broadcast %cst_129 : f32 to vector<16x1xf32>
    %302 = arith.addf %298, %301 : vector<16x1xf32>
    %303 = math.rsqrt %302 : vector<16x1xf32>
    %304 = vector.broadcast %303 : vector<16x1xf32> to vector<16x32xf32>
    %305 = arith.mulf %300, %304 : vector<16x32xf32>
    %306 = vector.broadcast %285 : vector<1x32xf32> to vector<16x32xf32>
    %307 = arith.mulf %305, %306 : vector<16x32xf32>
    %308 = vector.broadcast %287 : vector<1x32xf32> to vector<16x32xf32>
    %309 = arith.addf %307, %308 : vector<16x32xf32>
    %310 = vector.shape_cast %309 : vector<16x32xf32> to vector<2x8x32xf32>
    %311 = vector.extract_strided_slice %310 {offsets = [0, 0, 0], sizes = [2, 1, 32], strides = [1, 1, 1]} : vector<2x8x32xf32> to vector<2x1x32xf32>
    %312 = vector.shape_cast %311 : vector<2x1x32xf32> to vector<2x32xf32>
    %c8 = arith.constant 8 : index
    %c0_130 = arith.constant 0 : index
    %313 = vector.load %arg3[%c8, %c0_130] : memref<40x128xf32, #tpu.memory_space<vmem>>, vector<32x39xf32>
    %314 = vector.extract_strided_slice %313 {offsets = [0, 0], sizes = [32, 32], strides = [1, 1]} : vector<32x39xf32> to vector<32x32xf32>
    %cst_131 = arith.constant dense<0.000000e+00> : vector<2x32xf32>
    %315 = tpu.matmul %312, %314, %cst_131 {dimension_numbers = #tpu.dot_dimension_numbers<[1], [0], [0], [1], [0, 0, 1, 1], [], []>} : vector<2x32xf32>, vector<32x32xf32>, vector<2x32xf32> -> vector<2x32xf32>
    %c2_132 = arith.constant 2 : index
    %c0_133 = arith.constant 0 : index
    %316 = vector.load %arg3[%c2_132, %c0_133] : memref<40x128xf32, #tpu.memory_space<vmem>>, vector<1x32xf32>
    %317 = vector.broadcast %316 : vector<1x32xf32> to vector<2x32xf32>
    %318 = arith.addf %315, %317 : vector<2x32xf32>
    %319 = math.tanh %318 : vector<2x32xf32>
    %320 = vector.extract_strided_slice %313 {offsets = [0, 32], sizes = [32, 7], strides = [1, 1]} : vector<32x39xf32> to vector<32x7xf32>
    %cst_134 = arith.constant dense<0.000000e+00> : vector<2x7xf32>
    %321 = tpu.matmul %319, %320, %cst_134 {dimension_numbers = #tpu.dot_dimension_numbers<[1], [0], [0], [1], [0, 0, 1, 1], [], []>} : vector<2x32xf32>, vector<32x7xf32>, vector<2x7xf32> -> vector<2x7xf32>
    %c3_135 = arith.constant 3 : index
    %c0_136 = arith.constant 0 : index
    %322 = vector.load %arg3[%c3_135, %c0_136] : memref<40x128xf32, #tpu.memory_space<vmem>>, vector<1x7xf32>
    %323 = vector.broadcast %322 : vector<1x7xf32> to vector<2x7xf32>
    %324 = arith.addf %321, %323 : vector<2x7xf32>
    %325 = vector.extract_strided_slice %324 {offsets = [0, 0], sizes = [2, 5], strides = [1, 1]} : vector<2x7xf32> to vector<2x5xf32>
    %cst_137 = arith.constant dense<0xFF800000> : vector<2xf32>
    %326 = vector.multi_reduction <maximumf>, %325, %cst_137 [1] : vector<2x5xf32> to vector<2xf32>
    %327 = vector.shape_cast %326 : vector<2xf32> to vector<2x1xf32>
    %328 = vector.broadcast %327 : vector<2x1xf32> to vector<2x5xf32>
    %329 = arith.subf %325, %328 : vector<2x5xf32>
    %330 = math.exp %329 : vector<2x5xf32>
    %cst_138 = arith.constant dense<0.000000e+00> : vector<2xf32>
    %331 = vector.multi_reduction <add>, %330, %cst_138 [1] : vector<2x5xf32> to vector<2xf32>
    %332 = vector.shape_cast %331 : vector<2xf32> to vector<2x1xf32>
    %333 = tpu.reciprocal %332 {approx = true} : vector<2x1xf32> -> vector<2x1xf32>
    %334 = vector.broadcast %333 : vector<2x1xf32> to vector<2x5xf32>
    %335 = arith.mulf %330, %334 : vector<2x5xf32>
    %336 = vector.extract_strided_slice %324 {offsets = [0, 5], sizes = [2, 1], strides = [1, 1]} : vector<2x7xf32> to vector<2x1xf32>
    %337 = arith.negf %336 : vector<2x1xf32>
    %338 = math.exp %337 : vector<2x1xf32>
    %cst_139 = arith.constant 1.000000e+00 : f32
    %339 = vector.broadcast %cst_139 : f32 to vector<2x1xf32>
    %340 = arith.addf %339, %338 : vector<2x1xf32>
    %341 = arith.divf %339, %340 : vector<2x1xf32>
    %342 = vector.extract_strided_slice %324 {offsets = [0, 6], sizes = [2, 1], strides = [1, 1]} : vector<2x7xf32> to vector<2x1xf32>
    %343 = arith.negf %342 : vector<2x1xf32>
    %344 = math.exp %343 : vector<2x1xf32>
    %cst_140 = arith.constant 1.000000e+00 : f32
    %345 = vector.broadcast %cst_140 : f32 to vector<2x1xf32>
    %346 = arith.addf %345, %344 : vector<2x1xf32>
    %347 = arith.divf %345, %346 : vector<2x1xf32>
    %cst_141 = arith.constant 5.000000e+00 : f32
    %348 = vector.broadcast %cst_141 : f32 to vector<2x1xf32>
    %349 = arith.mulf %347, %348 : vector<2x1xf32>
    %cst_142 = arith.constant 0.000000e+00 : f32
    %350 = vector.broadcast %cst_142 : f32 to vector<2x128xf32>
    %c0_143 = arith.constant 0 : index
    %c0_144 = arith.constant 0 : index
    %351 = vector.load %arg6[%c0_143, %c0_144] : memref<2x128xf32, #tpu.memory_space<vmem>>, vector<2x128xf32>
    tpu.vector_store %arg6[%c0_143, %c0_144], %350 {strides = array<i32>} : memref<2x128xf32, #tpu.memory_space<vmem>>, vector<2x128xf32>,
    %c0_145 = arith.constant 0 : index
    %c0_146 = arith.constant 0 : index
    %352 = vector.load %arg6[%c0_145, %c0_146] : memref<2x128xf32, #tpu.memory_space<vmem>>, vector<2x32xf32>
    tpu.vector_store %arg6[%c0_145, %c0_146], %319 {strides = array<i32>} : memref<2x128xf32, #tpu.memory_space<vmem>>, vector<2x32xf32>,
    %c0_147 = arith.constant 0 : index
    %c32_148 = arith.constant 32 : index
    %353 = vector.load %arg6[%c0_147, %c32_148] : memref<2x128xf32, #tpu.memory_space<vmem>>, vector<2x5xf32>
    tpu.vector_store %arg6[%c0_147, %c32_148], %335 {strides = array<i32>} : memref<2x128xf32, #tpu.memory_space<vmem>>, vector<2x5xf32>,
    %c0_149 = arith.constant 0 : index
    %c37 = arith.constant 37 : index
    %354 = vector.load %arg6[%c0_149, %c37] : memref<2x128xf32, #tpu.memory_space<vmem>>, vector<2x1xf32>
    tpu.vector_store %arg6[%c0_149, %c37], %341 {strides = array<i32>} : memref<2x128xf32, #tpu.memory_space<vmem>>, vector<2x1xf32>,
    %c0_150 = arith.constant 0 : index
    %c38 = arith.constant 38 : index
    %355 = vector.load %arg6[%c0_150, %c38] : memref<2x128xf32, #tpu.memory_space<vmem>>, vector<2x1xf32>
    tpu.vector_store %arg6[%c0_150, %c38], %349 {strides = array<i32>} : memref<2x128xf32, #tpu.memory_space<vmem>>, vector<2x1xf32>,
    return
  }
  func.func @transform_0(%arg0: i32) -> (i32, i32, i32) {
    %c0_i32 = arith.constant 0 : i32
    %c0_i32_0 = arith.constant 0 : i32
    %c0_i32_1 = arith.constant 0 : i32
    return %arg0, %c0_i32, %c0_i32_0 : i32, i32, i32
  }
  func.func @transform_1(%arg0: i32) -> (i32, i32) {
    %c0_i32 = arith.constant 0 : i32
    %c0_i32_0 = arith.constant 0 : i32
    return %arg0, %c0_i32 : i32, i32
  }
  func.func @transform_2(%arg0: i32) -> (i32, i32) {
    %c0_i32 = arith.constant 0 : i32
    %c0_i32_0 = arith.constant 0 : i32
    %c0_i32_1 = arith.constant 0 : i32
    return %c0_i32, %c0_i32_0 : i32, i32
  }
  func.func @transform_3(%arg0: i32) -> (i32, i32, i32) {
    %c0_i32 = arith.constant 0 : i32
    %c0_i32_0 = arith.constant 0 : i32
    %c0_i32_1 = arith.constant 0 : i32
    %c0_i32_2 = arith.constant 0 : i32
    return %c0_i32, %c0_i32_0, %c0_i32_1 : i32, i32, i32
  }
  func.func @transform_4(%arg0: i32) -> (i32, i32, i32) {
    %c0_i32 = arith.constant 0 : i32
    %c0_i32_0 = arith.constant 0 : i32
    %c0_i32_1 = arith.constant 0 : i32
    %c0_i32_2 = arith.constant 0 : i32
    return %c0_i32, %c0_i32_0, %c0_i32_1 : i32, i32, i32
  }
  func.func @transform_5(%arg0: i32) -> (i32, i32) {
    %c0_i32 = arith.constant 0 : i32
    %c0_i32_0 = arith.constant 0 : i32
    return %arg0, %c0_i32 : i32, i32
  }
}

</mosaic_0001>

<bundles_post_ra>
// kernel: _fused_forward.1
= control target key start
LH: loop header
LB: loop body
LE: loop exit
PB: predicated region body
PF: predicated region fallthrough
CT: control target
= control target key end

     0   :  { %vm25_vm0 = vcmask 261120   ;;  %v2476_v14 = vmov 0.0   ;;  %vm2477_vm1 = vmmov 0   ;;  %s2478_s6 = smov 96   ;;  %vm170_vm2 = vcmask 130048   ;;  %s2481_s9 = smov 80   ;;  %s2949_s0 = inlined_call_operand.vmem [shape: f32[2,8,32], index: 0, kind: input, shape index: {}]   ;;  %s2950_s4 = inlined_call_operand.vmem [shape: bf16[2,160,128], index: 4, kind: input, shape index: {}]   ;;  %s2951_s2 = inlined_call_operand.vmem [shape: f32[40,128], index: 2, kind: input, shape index: {}]   ;;  %s2952_s3 = inlined_call_operand.vmem [shape: f32[2,8,128], index: 3, kind: input, shape index: {}]   ;;  %s2953_s1 = inlined_call_operand.vmem [shape: f32[2,8], index: 1, kind: input, shape index: {}]   ;;  %s2954_s5 = inlined_call_operand.vmem [shape: f32[2,128], index: 5, kind: output, shape index: {}]  }
   0x1   :  { %v21_v0 = vld [vmem:[%s2949_s0] sm:$0xff]  ;;  %v22_v1 = vld [vmem:[%s2949_s0 + $0x8] sm:$0xff]  ;;  %2176 = vmatprep.subr.bf16.mxu0 %v2476_v14  ;;  %2180 = vmatprep.mubr.msk.bf16.mxu0 %vm2477_vm1, %v2476_v14  ;;  %v2479_v47 = vmov 1966171168   ;;  %v78_v49 = vlaneseq  ;;  %vm270_vm3 = vcmask 64512   ;;  %vm300_vm4 = vcmask 1043456  }
   0x2   :  { %v26_v2 = vsel %vm25_vm0, %v21_v0, 0.0  ;;  %v29_v3 = vsel %vm25_vm0, %v22_v1, 0.0  ;;  %v2386_v15 = vld [vmem:[%s2950_s4 + $0x8] sm:$0xff]   ;;  %2184 = vmatprep.subr.bf16.mxu1 %v2476_v14  ;;  %2186 = vmatprep.mubr.msk.bf16.mxu1 %vm2477_vm1, %v2476_v14  ;;  %v2387_v16 = vld [vmem:[%s2950_s4] sm:$0xff]   ;;  %v76_v48 = vunpack.c.l.s4 %v2479_v47  ;;  %s2482_s10 = smov 112   ;;  %s2483_s11 = smov 48  }
   0x3   :  { %27 = vadd.xlane.f32.xlu0 %v26_v2  ;;  %2177 = vmatpush3.bf16.msra.mxu0 %v2386_v15  ;;  %v2010_v25 = vld [vmem:[%s2951_s2] ss:$0 sm:$0xff]  ;;  %v2011_v29 = vld [vmem:[%s2951_s2 + $0x1] ss:$0 sm:$0xff]  ;;  %v79_v51 = vshrl.u32 %v78_v49, 7  ;;  %s2484_s16 = smov 16  }
   0x4   :  { %2178 = vmatprep.subr.bf16.mxu0 %v2476_v14  ;;  %v2013_v34 = vld [vmem:[%s2952_s3] ss:$0 sm:$0xff]  ;;  %v77_v50 = vunpack.c.0.s8 %v76_v48  ;;  %vm856_vm5 = vcmask 523264   ;;  %vm1797_vm6 = vcmask 1041409   ;;  %1985 = vst [vmem:[%s2954_s5] sm:$0x3] %v2476_v14  ;;  %vm1986_vm7 = vcmask 254976  }
   0x5   :  { %v2012_v53 = vld.sshfl [vmem:[%s2953_s1] sm:$0x11 pattern:$0x75316420]  ;;  %v91_v55 = vsub.s32 0, %v79_v51  ;;  %s2480_s1 = smov 64  }
   0x6   :  { %v80_v52 = vsub.s32 %v77_v50, %v79_v51  ;;  %v74_v56 = vcombine.high %v2012_v53, %v2012_v53  ;;  %vm1966_vm8 = vcmask 33792   ;;  %vm1992_vm9 = vcmask 296192  }
   0x7   :  { %30 = vadd.xlane.f32.xlu0 %v29_v3  ;;  %2179 = vmatpush3.bf16.msra.mxu0 %v2387_v16  ;;  %vm1998_vm10 = vcmask 304424   ;;  %vm2004_vm11 = vcmask 312624  }
   0x8   :  { %2190 = vmatprep.subr.bf16.mxu0 %v2476_v14  ;;  %v81_v54 = vrot.slane %v2012_v53, %v80_v52  ;;  %v88_v58 = vrot.slane %v74_v56, %v80_v52 }
   0xa   :  { %v2581_v57 = vrot.slane %v81_v54, %v91_v55  ;;  %v2584_v63 = vrot.slane %v88_v58, %v91_v55 }
  0x8c   :  { %v28_v4 = vpop.xlane.xlu0 %27 }
  0x8d   :  { %v33_v5 = vmul.f32 0.03125, %v28_v4 }
  0x8f   :  { %v35_v6 = vsub.f32 %v21_v0, %v33_v5 }
  0x90   :  { %v31_v7 = vpop.xlane.xlu0 %30 }
  0x91   :  { %v34_v8 = vmul.f32 0.03125, %v31_v7  ;;  %v37_v9 = vmul.f32 %v35_v6, %v35_v6 }
  0x93   :  { %v36_v10 = vsub.f32 %v22_v1, %v34_v8  ;;  %v39_v11 = vsel %vm25_vm0, %v37_v9, 0.0 }
  0x94   :  { %40 = vadd.xlane.f32.xlu1 %v39_v11 }
  0x95   :  { %v38_v12 = vmul.f32 %v36_v10, %v36_v10 }
  0x97   :  { %v42_v13 = vsel %vm25_vm0, %v38_v12, 0.0 }
  0x98   :  { %43 = vadd.xlane.f32.xlu1 %v42_v13 }
 0x11d   :  { %v41_v17 = vpop.xlane.xlu1 %40 }
 0x11e   :  { %v45_v18 = vmul.f32 0.03125, %v41_v17 }
 0x120   :  { %v47_v19 = vadd.f32 1e-12, %v45_v18 }
 0x121   :  { %v44_v20 = vpop.xlane.xlu1 %43 }
 0x122   :  { %2406 = vrsqrt.f32 %v47_v19  ;;  %v46_v21 = vmul.f32 0.03125, %v44_v20 }
 0x124   :  { %v48_v22 = vadd.f32 1e-12, %v46_v21 }
 0x126   :  { %2408 = vrsqrt.f32 %v48_v22 }
 0x12f   :  { %v2407_v23 = vpop.eup %2406 }
 0x130   :  { %v51_v24 = vmul.f32 %v2407_v23, %v35_v6 }
 0x132   :  { %v57_v28 = vmul.f32 %v2010_v25, %v51_v24 }
 0x133   :  { %v2409_v26 = vpop.eup %2408 }
 0x134   :  { %v52_v27 = vmul.f32 %v2409_v26, %v36_v10  ;;  %v2546_v31 = vadd.f32 %v2011_v29, %v57_v28 }
 0x136   :  { %v58_v30 = vmul.f32 %v2010_v25, %v52_v27 }
 0x138   :  { %v2548_v32 = vadd.f32 %v2011_v29, %v58_v30 }
 0x13a   :  { %v99_v33 = vpack.c.bf16 %v2548_v32, %v2546_v31 }
 0x13c   :  { %2181 = vmatmul.mubr.msk.bf16.vlgmr.msra.gmra.mxu0 %vm25_vm0, %v99_v33 }
 0x13d   :  { %2192 = vmatprep.mubr.msk.bf16.mxu0 %vm2477_vm1, %v2476_v14 }
 0x1fc   :  { %v158_v35 = vpop.f32.mrf.mxu0 }
 0x1fd   :  { %v159_v36 = vadd.f32 %v2013_v34, %v158_v35 }
 0x1fe   :  { %v2182_v37 = vpop.f32.mrf.mxu0 }
 0x1ff   :  { %v2558_v38 = vpack.c.bf16 %v159_v36, %v159_v36 }
 0x200   :  { %v161_v39 = vpop.f32.mrf.mxu0 }
 0x201   :  { %v162_v40 = vadd.f32 %v2013_v34, %v161_v39  ;;  %168 = vrot.lane.b32.xlu0 %v2558_v38, %s2478_s6 }
 0x202   :  { %v2183_v41 = vpop.f32.mrf.mxu0 }
 0x203   :  { %v2562_v42 = vpack.c.bf16 %v162_v40, %v162_v40 }
 0x205   :  { %218 = vrot.lane.b32.xlu1 %v2562_v42, %s2478_s6 }
 0x273   :  { %v169_v43 = vpop.permute.xlu0 %168 }
 0x274   :  { %v175_v44 = vsel %vm170_vm2, %v169_v43, 0 }
 0x275   :  { %2185 = vmatpush3.bf16.xpose.msra.mxu1 %v175_v44 }
 0x276   :  { %2196 = vmatprep.subr.bf16.mxu1 %v2476_v14 }
 0x277   :  { %v219_v45 = vpop.permute.xlu1 %218 }
 0x278   :  { %v224_v46 = vsel %vm170_vm2, %v219_v45, 0 }
 0x279   :  { %2191 = vmatpush3.bf16.xpose.msra.mxu0 %v224_v46 }
 0x27a   :  { %2202 = vmatprep.subr.bf16.mxu0 %v2476_v14 }
 0x27c   :  { %2187 = vmatmul.mubr.msk.bf16.vlgmr.msra.gmra.mxu1 %vm170_vm2, %v2558_v38 }
 0x27d   :  { %2198 = vmatprep.mubr.msk.bf16.mxu1 %vm2477_vm1, %v2476_v14 }
 0x280   :  { %2193 = vmatmul.mubr.msk.bf16.vlgmr.msra.gmra.mxu0 %vm170_vm2, %v2562_v42 }
 0x281   :  { %2204 = vmatprep.mubr.msk.bf16.mxu0 %vm2477_vm1, %v2476_v14 }
 0x33c   :  { %v211_v59 = vpop.f32.mrf.mxu1 }
 0x33d   :  { %v266_v60 = vmul.f32 0.25, %v211_v59 }
 0x33e   :  { %v2188_v61 = vpop.f32.mrf.mxu1 }
 0x33f   :  { %v268_v62 = vadd.f32 %v266_v60, %v2581_v57 }
 0x340   :  { %v214_v0 = vpop.f32.mrf.mxu1  ;;  %v260_v1 = vpop.f32.mrf.mxu0 }
 0x341   :  { %v267_v2 = vmul.f32 0.25, %v260_v1  ;;  %v271_v3 = vsel %vm270_vm3, %v268_v62, -inf }
 0x342   :  { %v2189_v4 = vpop.f32.mrf.mxu1  ;;  %272 = vmax.xlane.f32.xlu1 %v271_v3  ;;  %v2194_v5 = vpop.f32.mrf.mxu0 }
 0x343   :  { %v269_v6 = vadd.f32 %v267_v2, %v2584_v63 }
 0x344   :  { %v263_v7 = vpop.f32.mrf.mxu0 }
 0x345   :  { %v274_v8 = vsel %vm270_vm3, %v269_v6, -inf }
 0x346   :  { %275 = vmax.xlane.f32.xlu0 %v274_v8  ;;  %v2195_v9 = vpop.f32.mrf.mxu0 }
 0x353   :  { %344 = vrot.lane.b32.xlu1 %v2562_v42, %s2480_s1 }
 0x357   :  { %394 = vrot.lane.b32.xlu1 %v2558_v38, %s2481_s9 }
 0x3cb   :  { %v273_v10 = vpop.xlane.xlu1 %272 }
 0x3cc   :  { %v277_v11 = vsub.f32 %v268_v62, %v273_v10 }
 0x3ce   :  { %v279_v12 = vmul.f32 1.442695, %v277_v11 }
 0x3cf   :  { %v345_v13 = vpop.permute.xlu1 %344  ;;  %v276_v15 = vpop.xlane.xlu0 %275 }
 0x3d0   :  { %2410 = vpow2.f32 %v279_v12  ;;  %v350_v16 = vsel %vm300_vm4, %v345_v13, 0  ;;  %v278_v17 = vsub.f32 %v269_v6, %v276_v15 }
 0x3d1   :  { %2203 = vmatpush3.bf16.msra.mxu0 %v350_v16 }
 0x3d2   :  { %v281_v18 = vmul.f32 1.442695, %v278_v17  ;;  %2214 = vmatprep.subr.bf16.mxu0 %v2476_v14 }
 0x3d3   :  { %v395_v23 = vpop.permute.xlu1 %394 }
 0x3d4   :  { %2412 = vpow2.f32 %v281_v18  ;;  %v400_v34 = vsel %vm170_vm2, %v395_v23, 0 }
 0x3dd   :  { %v2411_v19 = vpop.eup %2410 }
 0x3de   :  { %v283_v20 = vsel %vm270_vm3, %v2411_v19, 0.0 }
 0x3df   :  { %284 = vadd.xlane.f32.xlu0 %v283_v20 }
 0x3e1   :  { %v2413_v21 = vpop.eup %2412 }
 0x3e2   :  { %v286_v22 = vsel %vm270_vm3, %v2413_v21, 0.0 }
 0x3e3   :  { %287 = vadd.xlane.f32.xlu1 %v286_v22 }
 0x3f4   :  { %444 = vrot.lane.b32.xlu1 %v2562_v42, %s2481_s9 }
 0x3f5   :  { %295 = vrot.lane.b32.xlu0 %v2558_v38, %s2480_s1 }
 0x3f8   :  { %442 = vrot.lane.b32.xlu1 %v2562_v42, %s2482_s10 }
 0x3f9   :  { %392 = vrot.lane.b32.xlu0 %v2558_v38, %s2482_s10 }
 0x468   :  { %v285_v24 = vpop.xlane.xlu0 %284 }
 0x469   :  { %2414 = vrcp.f32 %v285_v24  ;;  %v2388_v24 = vld [vmem:[%s2950_s4 + $0x18] sm:$0xff]  }
 0x46c   :  { %v288_v25 = vpop.xlane.xlu1 %287  ;;  %v296_v26 = vpop.permute.xlu0 %295 }
 0x46d   :  { %2416 = vrcp.f32 %v288_v25  ;;  %v302_v27 = vsel %vm300_vm4, %v296_v26, 0  ;;  %v2389_v25 = vld [vmem:[%s2950_s4 + $0x10] sm:$0xff]  }
 0x46e   :  { %2197 = vmatpush3.bf16.msra.mxu1 %v302_v27 }
 0x46f   :  { %2208 = vmatprep.subr.bf16.mxu1 %v2476_v14 }
 0x470   :  { %v445_v36 = vpop.permute.xlu1 %444  ;;  %v393_v40 = vpop.permute.xlu0 %392 }
 0x471   :  { %v450_v39 = vsel %vm170_vm2, %v445_v36, 0 }
 0x474   :  { %v443_v41 = vpop.permute.xlu1 %442 }
 0x476   :  { %v2415_v28 = vpop.eup %2414 }
 0x477   :  { %v290_v29 = vmul.f32 %v2415_v28, %v2411_v19 }
 0x479   :  { %v293_v30 = vpack.c.bf16 %v290_v29, %v290_v29 }
 0x47a   :  { %v2417_v33 = vpop.eup %2416 }
 0x47b   :  { %2199 = vmatmul.mubr.msk.bf16.vlgmr.msra.gmra.mxu1 %vm270_vm3, %v293_v30  ;;  %v292_v35 = vmul.f32 %v2417_v33, %v2413_v21 }
 0x47c   :  { %2209 = vmatpush3.bf16.xpose.msra.mxu1 %v400_v34  ;;  %2210 = vmatprep.mubr.msk.bf16.mxu1 %vm2477_vm1, %v2476_v14 }
 0x47d   :  { %v294_v37 = vpack.c.bf16 %v292_v35, %v292_v35  ;;  %2220 = vmatprep.subr.bf16.mxu1 %v2476_v14 }
 0x47f   :  { %2205 = vmatmul.mubr.msk.bf16.vlgmr.msra.gmra.mxu0 %vm270_vm3, %v294_v37 }
 0x480   :  { %2215 = vmatpush3.bf16.xpose.msra.mxu0 %v450_v39  ;;  %2216 = vmatprep.mubr.msk.bf16.mxu0 %vm2477_vm1, %v2476_v14 }
 0x481   :  { %2226 = vmatprep.subr.bf16.mxu0 %v2476_v14 }
 0x483   :  { %2211 = vmatmul.mubr.msk.bf16.vlgmr.msra.gmra.mxu1 %vm170_vm2, %v393_v40 }
 0x484   :  { %2222 = vmatprep.mubr.msk.bf16.mxu1 %vm2477_vm1, %v2476_v14 }
 0x487   :  { %2217 = vmatmul.mubr.msk.bf16.vlgmr.msra.gmra.mxu0 %vm170_vm2, %v443_v41 }
 0x488   :  { %2228 = vmatprep.mubr.msk.bf16.mxu0 %vm2477_vm1, %v2476_v14 }
 0x53b   :  { %v2623_v43 = vpop.f32.mrf.mxu1 }
 0x53d   :  { %v2200_v44 = vpop.f32.mrf.mxu1 }
 0x53f   :  { %v341_v45 = vpop.f32.mrf.mxu1  ;;  %v2625_v46 = vpop.f32.mrf.mxu0 }
 0x541   :  { %v2201_v47 = vpop.f32.mrf.mxu1  ;;  %v2206_v48 = vpop.f32.mrf.mxu0 }
 0x542   :  { %v2025_v47 = vld [vmem:[%s2952_s3 + $0x1] ss:$0 sm:$0xff] }
 0x543   :  { %v389_v49 = vpop.f32.mrf.mxu0  ;;  %v436_v50 = vpop.f32.mrf.mxu1 }
 0x544   :  { %v492_v51 = vmul.f32 0.25, %v436_v50 }
 0x545   :  { %v2207_v52 = vpop.f32.mrf.mxu0  ;;  %v2212_v53 = vpop.f32.mrf.mxu1 }
 0x546   :  { %v494_v54 = vadd.f32 %v492_v51, %v2581_v57 }
 0x547   :  { %v439_v55 = vpop.f32.mrf.mxu1  ;;  %v486_v56 = vpop.f32.mrf.mxu0 }
 0x548   :  { %v493_v58 = vmul.f32 0.25, %v486_v56  ;;  %v496_v59 = vsel %vm270_vm3, %v494_v54, -inf }
 0x549   :  { %497 = vmax.xlane.f32.xlu0 %v496_v59  ;;  %v2213_v60 = vpop.f32.mrf.mxu1  ;;  %v2218_v61 = vpop.f32.mrf.mxu0 }
 0x54a   :  { %v495_v62 = vadd.f32 %v493_v58, %v2584_v63 }
 0x54b   :  { %v489_v0 = vpop.f32.mrf.mxu0 }
 0x54c   :  { %v499_v1 = vsel %vm270_vm3, %v495_v62, -inf }
 0x54d   :  { %500 = vmax.xlane.f32.xlu1 %v499_v1  ;;  %v2219_v2 = vpop.f32.mrf.mxu0 }
 0x55e   :  { %568 = vrot.lane.b32.xlu1 %v2562_v42, %s2483_s11 }
 0x5d2   :  { %v498_v3 = vpop.xlane.xlu0 %497 }
 0x5d3   :  { %v502_v4 = vsub.f32 %v494_v54, %v498_v3  ;;  %v2391_v3 = vld [vmem:[%s2950_s4 + $0x20] sm:$0xff]  }
 0x5d5   :  { %v504_v5 = vmul.f32 1.442695, %v502_v4 }
 0x5d6   :  { %v501_v6 = vpop.xlane.xlu1 %500 }
 0x5d7   :  { %2418 = vpow2.f32 %v504_v5  ;;  %v503_v7 = vsub.f32 %v495_v62, %v501_v6 }
 0x5d9   :  { %v506_v8 = vmul.f32 1.442695, %v503_v7 }
 0x5da   :  { %v569_v9 = vpop.permute.xlu1 %568 }
 0x5db   :  { %2420 = vpow2.f32 %v506_v8  ;;  %v574_v10 = vsel %vm300_vm4, %v569_v9, 0 }
 0x5dc   :  { %2227 = vmatpush3.bf16.msra.mxu0 %v574_v10 }
 0x5dd   :  { %2240 = vmatprep.subr.bf16.mxu0 %v2476_v14 }
 0x5e4   :  { %v2419_v11 = vpop.eup %2418 }
 0x5e5   :  { %v508_v12 = vsel %vm270_vm3, %v2419_v11, 0.0 }
 0x5e6   :  { %509 = vadd.xlane.f32.xlu0 %v508_v12  ;;  %v2029_v12 = vld [vmem:[%s2952_s3 + $0x2] ss:$0 sm:$0xff] }
 0x5e8   :  { %v2421_v13 = vpop.eup %2420 }
 0x5e9   :  { %v511_v42 = vsel %vm270_vm3, %v2421_v13, 0.0 }
 0x5ea   :  { %512 = vadd.xlane.f32.xlu0 %v511_v42 }
 0x600   :  { %520 = vrot.lane.b32.xlu0 %v2558_v38, %s2483_s11 }
 0x66f   :  { %v510_v15 = vpop.xlane.xlu0 %509 }
 0x670   :  { %2422 = vrcp.f32 %v510_v15 }
 0x673   :  { %v513_v16 = vpop.xlane.xlu0 %512 }
 0x674   :  { %2424 = vrcp.f32 %v513_v16  ;;  %v2030_v16 = vld [vmem:[%s2952_s3 + $0x3] ss:$0 sm:$0xff] }
 0x677   :  { %v521_v17 = vpop.permute.xlu0 %520 }
 0x678   :  { %v526_v18 = vsel %vm300_vm4, %v521_v17, 0 }
 0x679   :  { %2221 = vmatpush3.bf16.msra.mxu1 %v526_v18 }
 0x67a   :  { %2232 = vmatprep.subr.bf16.mxu1 %v2476_v14 }
 0x67d   :  { %v2423_v19 = vpop.eup %2422 }
 0x67e   :  { %v515_v20 = vmul.f32 %v2423_v19, %v2419_v11 }
 0x680   :  { %v518_v21 = vpack.c.bf16 %v515_v20, %v515_v20 }
 0x681   :  { %v2425_v22 = vpop.eup %2424 }
 0x682   :  { %2223 = vmatmul.mubr.msk.bf16.vlgmr.msra.gmra.mxu1 %vm270_vm3, %v518_v21  ;;  %v517_v23 = vmul.f32 %v2425_v22, %v2421_v13  ;;  %v2392_v21 = vld [vmem:[%s2950_s4 + $0x48] sm:$0xff]   ;;  %v2393_v22 = vld [vmem:[%s2950_s4 + $0x40] sm:$0xff]  }
 0x683   :  { %2236 = vmatprep.mubr.msk.bf16.mxu1 %vm2477_vm1, %v2476_v14  ;;  %2233 = vmatpush3.bf16.msra.mxu1 %v2388_v24  ;;  %v2031_v24 = vld [vmem:[%s2952_s3 + $0x4] ss:$0 sm:$0xff] }
 0x684   :  { %v519_v38 = vpack.c.bf16 %v517_v23, %v517_v23  ;;  %2234 = vmatprep.subr.bf16.mxu1 %v2476_v14  ;;  %v2394_v23 = vld [vmem:[%s2950_s4 + $0x38] sm:$0xff]  }
 0x686   :  { %2229 = vmatmul.mubr.msk.bf16.vlgmr.msra.gmra.mxu0 %vm270_vm3, %v519_v38  ;;  %v2395_v38 = vld [vmem:[%s2950_s4 + $0x30] sm:$0xff]  }
 0x687   :  { %2244 = vmatprep.mubr.msk.bf16.mxu0 %vm2477_vm1, %v2476_v14  ;;  %2235 = vmatpush3.bf16.msra.mxu1 %v2389_v25 }
 0x688   :  { %2248 = vmatprep.subr.bf16.mxu1 %v2476_v14 }
 0x742   :  { %v562_v26 = vpop.f32.mrf.mxu1 }
 0x744   :  { %v2224_v27 = vpop.f32.mrf.mxu1 }
 0x746   :  { %v565_v28 = vpop.f32.mrf.mxu1  ;;  %v610_v29 = vpop.f32.mrf.mxu0 }
 0x747   :  { %v2376_v30 = vpack.i.bf16 %v610_v29, %v562_v26 }
 0x748   :  { %v2225_v33 = vpop.f32.mrf.mxu1  ;;  %v2230_v34 = vpop.f32.mrf.mxu0 }
 0x749   :  { %2377 = vrot.lane.b32.xlu1 %v2376_v30, %s2484_s16 }
 0x74a   :  { %v613_v35 = vpop.f32.mrf.mxu0 }
 0x74c   :  { %v2231_v36 = vpop.f32.mrf.mxu0 }
 0x7bb   :  { %v2378_v37 = vpop.permute.xlu1 %2377 }
 0x7bc   :  { %v2380_v39 = vunpack.i.h.bf16 %v2378_v37  ;;  %v2379_v40 = vunpack.i.l.bf16 %v2378_v37 }
 0x7be   :  { %v625_v41 = vsel %vm170_vm2, %v2625_v46, %v2380_v39  ;;  %v624_v44 = vsel %vm170_vm2, %v2623_v43, %v2379_v40 }
 0x7bf   :  { %v626_v45 = vpack.c.bf16 %v625_v41, %v624_v44 }
 0x7c1   :  { %2237 = vmatmul.mubr.msk.bf16.vlgmr.msra.gmra.mxu1 %vm25_vm0, %v626_v45 }
 0x7c2   :  { %2256 = vmatprep.mubr.msk.bf16.mxu1 %vm2477_vm1, %v2476_v14  ;;  %2249 = vmatpush3.bf16.msra.mxu1 %v2392_v21  ;;  %v2041_v21 = vld [vmem:[%s2952_s3 + $0x6] ss:$0 sm:$0xff] }
 0x7c3   :  { %2250 = vmatprep.subr.bf16.mxu1 %v2476_v14 }
 0x7c6   :  { %2251 = vmatpush3.bf16.msra.mxu1 %v2393_v22 }
 0x7c7   :  { %2252 = vmatprep.subr.bf16.mxu1 %v2476_v14 }
 0x7ca   :  { %2253 = vmatpush3.bf16.msra.mxu1 %v2394_v23 }
 0x7cb   :  { %2254 = vmatprep.subr.bf16.mxu1 %v2476_v14 }
 0x7ce   :  { %2255 = vmatpush3.bf16.msra.mxu1 %v2395_v38 }
 0x7cf   :  { %2274 = vmatprep.subr.bf16.mxu1 %v2476_v14 }
 0x881   :  { %v685_v48 = vpop.f32.mrf.mxu1 }
 0x882   :  { %v686_v49 = vadd.f32 %v2025_v47, %v685_v48 }
 0x883   :  { %v2238_v50 = vpop.f32.mrf.mxu1 }
 0x884   :  { %v692_v51 = vadd.f32 %v686_v49, %v2546_v31 }
 0x885   :  { %v688_v52 = vpop.f32.mrf.mxu1 }
 0x886   :  { %v689_v46 = vadd.f32 %v2025_v47, %v688_v52  ;;  %v696_v53 = vsel %vm25_vm0, %v692_v51, 0.0 }
 0x887   :  { %697 = vadd.xlane.f32.xlu1 %v696_v53  ;;  %v2239_v43 = vpop.f32.mrf.mxu1 }
 0x888   :  { %v693_v54 = vadd.f32 %v689_v46, %v2548_v32  ;;  %v2390_v32 = vld [vmem:[%s2950_s4 + $0x28] sm:$0xff]  }
 0x889   :  { %2241 = vmatpush3.bf16.msra.mxu0 %v2390_v32 }
 0x88a   :  { %v699_v55 = vsel %vm25_vm0, %v693_v54, 0.0  ;;  %2242 = vmatprep.subr.bf16.mxu0 %v2476_v14 }
 0x88b   :  { %700 = vadd.xlane.f32.xlu0 %v699_v55 }
 0x88d   :  { %2243 = vmatpush3.bf16.msra.mxu0 %v2391_v3 }
 0x88e   :  { %2260 = vmatprep.subr.bf16.mxu0 %v2476_v14 }
 0x910   :  { %v698_v56 = vpop.xlane.xlu1 %697 }
 0x911   :  { %v702_v58 = vmul.f32 0.03125, %v698_v56 }
 0x913   :  { %v704_v59 = vsub.f32 %v692_v51, %v702_v58 }
 0x914   :  { %v701_v60 = vpop.xlane.xlu0 %700 }
 0x915   :  { %v703_v61 = vmul.f32 0.03125, %v701_v60  ;;  %v706_v62 = vmul.f32 %v704_v59, %v704_v59 }
 0x917   :  { %v705_v0 = vsub.f32 %v693_v54, %v703_v61  ;;  %v708_v31 = vsel %vm25_vm0, %v706_v62, 0.0  ;;  %v2035_v54 = vld [vmem:[%s2952_s3 + $0x5] ss:$0 sm:$0xff] }
 0x918   :  { %709 = vadd.xlane.f32.xlu0 %v708_v31 }
 0x919   :  { %v707_v1 = vmul.f32 %v705_v0, %v705_v0 }
 0x91b   :  { %v711_v2 = vsel %vm25_vm0, %v707_v1, 0.0 }
 0x91c   :  { %712 = vadd.xlane.f32.xlu0 %v711_v2 }
 0x9a1   :  { %v710_v4 = vpop.xlane.xlu0 %709 }
 0x9a2   :  { %v714_v5 = vmul.f32 0.03125, %v710_v4 }
 0x9a4   :  { %v716_v6 = vadd.f32 1e-12, %v714_v5 }
 0x9a5   :  { %v713_v7 = vpop.xlane.xlu0 %712 }
 0x9a6   :  { %2426 = vrsqrt.f32 %v716_v6  ;;  %v715_v8 = vmul.f32 0.03125, %v713_v7 }
 0x9a8   :  { %v717_v9 = vadd.f32 1e-12, %v715_v8 }
 0x9aa   :  { %2428 = vrsqrt.f32 %v717_v9 }
 0x9b3   :  { %v2427_v10 = vpop.eup %2426 }
 0x9b4   :  { %v720_v11 = vmul.f32 %v2427_v10, %v704_v59 }
 0x9b6   :  { %v726_v15 = vmul.f32 %v2029_v12, %v720_v11  ;;  %v2396_v11 = vld [vmem:[%s2950_s4 + $0x58] sm:$0xff]  }
 0x9b7   :  { %v2429_v13 = vpop.eup %2428 }
 0x9b8   :  { %v721_v42 = vmul.f32 %v2429_v13, %v705_v0  ;;  %v732_v18 = vadd.f32 %v2030_v16, %v726_v15 }
 0x9ba   :  { %v727_v17 = vmul.f32 %v2029_v12, %v721_v42  ;;  %v2397_v12 = vld [vmem:[%s2950_s4 + $0x50] sm:$0xff]  }
 0x9bc   :  { %v733_v19 = vadd.f32 %v2030_v16, %v727_v17 }
 0x9be   :  { %v734_v20 = vpack.c.bf16 %v733_v19, %v732_v18 }
 0x9c0   :  { %2245 = vmatmul.mubr.msk.bf16.vlgmr.msra.gmra.mxu0 %vm25_vm0, %v734_v20 }
 0x9c1   :  { %2264 = vmatprep.mubr.msk.bf16.mxu0 %vm2477_vm1, %v2476_v14  ;;  %2261 = vmatpush3.bf16.msra.mxu0 %v2396_v11 }
 0x9c2   :  { %2262 = vmatprep.subr.bf16.mxu0 %v2476_v14 }
 0x9c5   :  { %2263 = vmatpush3.bf16.msra.mxu0 %v2397_v12 }
 0x9c6   :  { %2268 = vmatprep.subr.bf16.mxu0 %v2476_v14 }
 0xa80   :  { %v793_v25 = vpop.f32.mrf.mxu0 }
 0xa81   :  { %v794_v26 = vadd.f32 %v2031_v24, %v793_v25 }
 0xa82   :  { %v2246_v27 = vpop.f32.mrf.mxu0 }
 0xa83   :  { %v800_v28 = vmul.f32 %v794_v26, %v794_v26 }
 0xa84   :  { %v796_v29 = vpop.f32.mrf.mxu0 }
 0xa85   :  { %v802_v30 = vmul.f32 %v800_v28, %v794_v26  ;;  %v797_v33 = vadd.f32 %v2031_v24, %v796_v29  ;;  %v2042_v24 = vld [vmem:[%s2952_s3 + $0x7] ss:$0 sm:$0xff]  ;;  %v2048_v29 = vld [vmem:[%s2952_s3 + $0x8] ss:$0 sm:$0xff] }
 0xa86   :  { %v2247_v34 = vpop.f32.mrf.mxu0 }
 0xa87   :  { %v804_v35 = vmul.f32 0.044715, %v802_v30  ;;  %v801_v36 = vmul.f32 %v797_v33, %v797_v33 }
 0xa89   :  { %v806_v37 = vadd.f32 %v804_v35, %v794_v26  ;;  %v803_v39 = vmul.f32 %v801_v36, %v797_v33 }
 0xa8b   :  { %v808_v40 = vmul.f32 0.7978846, %v806_v37  ;;  %v805_v41 = vmul.f32 0.044715, %v803_v39 }
 0xa8d   :  { %2430 = vtanh.f32 %v808_v40  ;;  %v807_v44 = vadd.f32 %v805_v41, %v797_v33 }
 0xa8f   :  { %v809_v45 = vmul.f32 0.7978846, %v807_v44 }
 0xa91   :  { %2432 = vtanh.f32 %v809_v45 }
 0xa9a   :  { %v2431_v47 = vpop.eup %2430 }
 0xa9b   :  { %v812_v48 = vadd.f32 1.0, %v2431_v47 }
 0xa9d   :  { %v814_v50 = vmul.f32 0.5, %v812_v48 }
 0xa9e   :  { %v2433_v49 = vpop.eup %2432 }
 0xa9f   :  { %v813_v51 = vadd.f32 1.0, %v2433_v49  ;;  %v816_v46 = vmul.f32 %v814_v50, %v794_v26 }
 0xaa1   :  { %v815_v52 = vmul.f32 0.5, %v813_v51 }
 0xaa3   :  { %v817_v53 = vmul.f32 %v815_v52, %v797_v33 }
 0xaa5   :  { %v818_v43 = vpack.c.bf16 %v817_v53, %v816_v46 }
 0xaa7   :  { %2257 = vmatmul.mubr.msk.bf16.vlgmr.msra.gmra.mxu1 %vm856_vm5, %v818_v43 }
 0xaa8   :  { %2276 = vmatprep.mubr.msk.bf16.mxu1 %vm2477_vm1, %v2476_v14 }
 0xb67   :  { %v894_v55 = vpop.f32.mrf.mxu1 }
 0xb68   :  { %v895_v56 = vadd.f32 %v2035_v54, %v894_v55 }
 0xb69   :  { %v2258_v58 = vpop.f32.mrf.mxu1 }
 0xb6a   :  { %v901_v59 = vadd.f32 %v895_v56, %v732_v18 }
 0xb6b   :  { %v897_v60 = vpop.f32.mrf.mxu1 }
 0xb6c   :  { %v898_v61 = vadd.f32 %v2035_v54, %v897_v60  ;;  %v905_v62 = vsel %vm25_vm0, %v901_v59, 0.0 }
 0xb6d   :  { %906 = vadd.xlane.f32.xlu1 %v905_v62  ;;  %v2259_v0 = vpop.f32.mrf.mxu1 }
 0xb6e   :  { %v902_v31 = vadd.f32 %v898_v61, %v733_v19 }
 0xb70   :  { %v908_v1 = vsel %vm25_vm0, %v902_v31, 0.0 }
 0xb71   :  { %909 = vadd.xlane.f32.xlu0 %v908_v1 }
 0xbf6   :  { %v907_v2 = vpop.xlane.xlu1 %906 }
 0xbf7   :  { %v911_v32 = vmul.f32 0.03125, %v907_v2 }
 0xbf9   :  { %v913_v3 = vsub.f32 %v901_v59, %v911_v32 }
 0xbfa   :  { %v910_v4 = vpop.xlane.xlu0 %909 }
 0xbfb   :  { %v912_v5 = vmul.f32 0.03125, %v910_v4  ;;  %v915_v6 = vmul.f32 %v913_v3, %v913_v3 }
 0xbfd   :  { %v914_v7 = vsub.f32 %v902_v31, %v912_v5  ;;  %v917_v8 = vsel %vm25_vm0, %v915_v6, 0.0 }
 0xbfe   :  { %918 = vadd.xlane.f32.xlu1 %v917_v8 }
 0xbff   :  { %v916_v9 = vmul.f32 %v914_v7, %v914_v7 }
 0xc01   :  { %v920_v10 = vsel %vm25_vm0, %v916_v9, 0.0 }
 0xc02   :  { %921 = vadd.xlane.f32.xlu0 %v920_v10 }
 0xc87   :  { %v919_v13 = vpop.xlane.xlu1 %918 }
 0xc88   :  { %v923_v42 = vmul.f32 0.03125, %v919_v13 }
 0xc8a   :  { %v925_v15 = vadd.f32 1e-12, %v923_v42 }
 0xc8b   :  { %v922_v16 = vpop.xlane.xlu0 %921 }
 0xc8c   :  { %2434 = vrsqrt.f32 %v925_v15  ;;  %v924_v17 = vmul.f32 0.03125, %v922_v16 }
 0xc8e   :  { %v926_v18 = vadd.f32 1e-12, %v924_v17 }
 0xc90   :  { %2436 = vrsqrt.f32 %v926_v18 }
 0xc99   :  { %v2435_v19 = vpop.eup %2434 }
 0xc9a   :  { %v929_v20 = vmul.f32 %v2435_v19, %v913_v3 }
 0xc9c   :  { %v935_v38 = vmul.f32 %v2041_v21, %v929_v20 }
 0xc9d   :  { %v2437_v22 = vpop.eup %2436 }
 0xc9e   :  { %v930_v23 = vmul.f32 %v2437_v22, %v914_v7  ;;  %v2732_v26 = vadd.f32 %v2042_v24, %v935_v38 }
 0xca0   :  { %v936_v25 = vmul.f32 %v2041_v21, %v930_v23 }
 0xca2   :  { %v2734_v27 = vadd.f32 %v2042_v24, %v936_v25 }
 0xca4   :  { %v943_v28 = vpack.c.bf16 %v2734_v27, %v2732_v26 }
 0xca6   :  { %2265 = vmatmul.mubr.msk.bf16.vlgmr.msra.gmra.mxu0 %vm25_vm0, %v943_v28 }
 0xca7   :  { %2270 = vmatprep.mubr.msk.bf16.mxu0 %vm2477_vm1, %v2476_v14 }
 0xd66   :  { %v1004_v30 = vpop.f32.mrf.mxu0 }
 0xd67   :  { %v1005_v33 = vadd.f32 %v2048_v29, %v1004_v30 }
 0xd68   :  { %v2266_v34 = vpop.f32.mrf.mxu0 }
 0xd69   :  { %v2744_v35 = vpack.c.bf16 %v1005_v33, %v1005_v33 }
 0xd6a   :  { %v1007_v36 = vpop.f32.mrf.mxu0 }
 0xd6b   :  { %v1008_v37 = vadd.f32 %v2048_v29, %v1007_v36  ;;  %1014 = vrot.lane.b32.xlu1 %v2744_v35, %s2478_s6 }
 0xd6c   :  { %v2267_v39 = vpop.f32.mrf.mxu0 }
 0xd6d   :  { %v2748_v40 = vpack.c.bf16 %v1008_v37, %v1008_v37 }
 0xd6f   :  { %1063 = vrot.lane.b32.xlu0 %v2748_v40, %s2478_s6 }
 0xddd   :  { %v1015_v41 = vpop.permute.xlu1 %1014 }
 0xdde   :  { %v1020_v44 = vsel %vm170_vm2, %v1015_v41, 0 }
 0xddf   :  { %2269 = vmatpush3.bf16.xpose.msra.mxu0 %v1020_v44 }
 0xde0   :  { %2280 = vmatprep.subr.bf16.mxu0 %v2476_v14 }
 0xde1   :  { %v1064_v45 = vpop.permute.xlu0 %1063 }
 0xde2   :  { %v1069_v47 = vsel %vm170_vm2, %v1064_v45, 0 }
 0xde3   :  { %2275 = vmatpush3.bf16.xpose.msra.mxu1 %v1069_v47 }
 0xde4   :  { %2286 = vmatprep.subr.bf16.mxu1 %v2476_v14 }
 0xde6   :  { %2271 = vmatmul.mubr.msk.bf16.vlgmr.msra.gmra.mxu0 %vm170_vm2, %v2744_v35 }
 0xde7   :  { %2282 = vmatprep.mubr.msk.bf16.mxu0 %vm2477_vm1, %v2476_v14 }
 0xdea   :  { %2277 = vmatmul.mubr.msk.bf16.vlgmr.msra.gmra.mxu1 %vm170_vm2, %v2748_v40 }
 0xdeb   :  { %2288 = vmatprep.mubr.msk.bf16.mxu1 %vm2477_vm1, %v2476_v14 }
 0xea6   :  { %v1056_v48 = vpop.f32.mrf.mxu0 }
 0xea7   :  { %v1111_v49 = vmul.f32 0.25, %v1056_v48 }
 0xea8   :  { %v2272_v50 = vpop.f32.mrf.mxu0 }
 0xea9   :  { %v1113_v51 = vadd.f32 %v1111_v49, %v2581_v57 }
 0xeaa   :  { %v1059_v52 = vpop.f32.mrf.mxu0  ;;  %v1105_v46 = vpop.f32.mrf.mxu1 }
 0xeab   :  { %v1112_v53 = vmul.f32 0.25, %v1105_v46  ;;  %v1115_v43 = vsel %vm270_vm3, %v1113_v51, -inf }
 0xeac   :  { %v2278_v54 = vpop.f32.mrf.mxu1  ;;  %1116 = vmax.xlane.f32.xlu1 %v1115_v43  ;;  %v2273_v55 = vpop.f32.mrf.mxu0 }
 0xead   :  { %v1114_v56 = vadd.f32 %v1112_v53, %v2584_v63 }
 0xeae   :  { %v1108_v58 = vpop.f32.mrf.mxu1 }
 0xeaf   :  { %v1118_v59 = vsel %vm270_vm3, %v1114_v56, -inf }
 0xeb0   :  { %1119 = vmax.xlane.f32.xlu0 %v1118_v59  ;;  %v2279_v60 = vpop.f32.mrf.mxu1 }
 0xebd   :  { %1139 = vrot.lane.b32.xlu1 %v2744_v35, %s2480_s1 }
 0xf35   :  { %v1117_v61 = vpop.xlane.xlu1 %1116 }
 0xf36   :  { %v1121_v62 = vsub.f32 %v1113_v51, %v1117_v61 }
 0xf38   :  { %v1123_v0 = vmul.f32 1.442695, %v1121_v62 }
 0xf39   :  { %v1120_v31 = vpop.xlane.xlu0 %1119  ;;  %v1140_v1 = vpop.permute.xlu1 %1139 }
 0xf3a   :  { %2438 = vpow2.f32 %v1123_v0  ;;  %v1122_v2 = vsub.f32 %v1114_v56, %v1120_v31  ;;  %v1145_v32 = vsel %vm300_vm4, %v1140_v1, 0 }
 0xf3b   :  { %2281 = vmatpush3.bf16.msra.mxu0 %v1145_v32 }
 0xf3c   :  { %v1125_v3 = vmul.f32 1.442695, %v1122_v2  ;;  %2292 = vmatprep.subr.bf16.mxu0 %v2476_v14 }
 0xf3e   :  { %2440 = vpow2.f32 %v1125_v3 }
 0xf47   :  { %v2439_v4 = vpop.eup %2438 }
 0xf48   :  { %v1127_v5 = vsel %vm270_vm3, %v2439_v4, 0.0 }
 0xf49   :  { %1128 = vadd.xlane.f32.xlu1 %v1127_v5 }
 0xf4b   :  { %v2441_v6 = vpop.eup %2440 }
 0xf4c   :  { %v1130_v7 = vsel %vm270_vm3, %v2441_v6, 0.0 }
 0xf4d   :  { %1131 = vadd.xlane.f32.xlu0 %v1130_v7  ;;  %v2398_v7 = vld [vmem:[%s2950_s4 + $0x68] sm:$0xff]  }
 0xf5a   :  { %1237 = vrot.lane.b32.xlu1 %v2744_v35, %s2481_s9 }
 0xf5e   :  { %1287 = vrot.lane.b32.xlu1 %v2748_v40, %s2481_s9 }
 0xf62   :  { %1235 = vrot.lane.b32.xlu1 %v2744_v35, %s2482_s10 }
 0xf63   :  { %1187 = vrot.lane.b32.xlu0 %v2748_v40, %s2480_s1 }
 0xf67   :  { %1285 = vrot.lane.b32.xlu0 %v2748_v40, %s2482_s10 }
 0xfd2   :  { %v1129_v8 = vpop.xlane.xlu1 %1128 }
 0xfd3   :  { %2442 = vrcp.f32 %v1129_v8  ;;  %v2399_v8 = vld [vmem:[%s2950_s4 + $0x60] sm:$0xff]  }
 0xfd6   :  { %v1132_v9 = vpop.xlane.xlu0 %1131  ;;  %v1238_v13 = vpop.permute.xlu1 %1237 }
 0xfd7   :  { %2444 = vrcp.f32 %v1132_v9  ;;  %v1243_v17 = vsel %vm170_vm2, %v1238_v13, 0 }
 0xfda   :  { %v1188_v10 = vpop.permute.xlu0 %1187  ;;  %v1288_v19 = vpop.permute.xlu1 %1287 }
 0xfdb   :  { %v1193_v11 = vsel %vm300_vm4, %v1188_v10, 0  ;;  %v1293_v21 = vsel %vm170_vm2, %v1288_v19, 0 }
 0xfdc   :  { %2287 = vmatpush3.bf16.msra.mxu1 %v1193_v11 }
 0xfdd   :  { %2298 = vmatprep.subr.bf16.mxu1 %v2476_v14 }
 0xfde   :  { %v1236_v22 = vpop.permute.xlu1 %1235  ;;  %v1286_v23 = vpop.permute.xlu0 %1285 }
 0xfe0   :  { %v2443_v12 = vpop.eup %2442 }
 0xfe1   :  { %v1134_v42 = vmul.f32 %v2443_v12, %v2439_v4 }
 0xfe3   :  { %v1137_v15 = vpack.c.bf16 %v1134_v42, %v1134_v42 }
 0xfe4   :  { %v2445_v16 = vpop.eup %2444 }
 0xfe5   :  { %2283 = vmatmul.mubr.msk.bf16.vlgmr.msra.gmra.mxu0 %vm270_vm3, %v1137_v15  ;;  %v1136_v18 = vmul.f32 %v2445_v16, %v2441_v6 }
 0xfe6   :  { %2293 = vmatpush3.bf16.xpose.msra.mxu0 %v1243_v17  ;;  %2294 = vmatprep.mubr.msk.bf16.mxu0 %vm2477_vm1, %v2476_v14 }
 0xfe7   :  { %v1138_v20 = vpack.c.bf16 %v1136_v18, %v1136_v18  ;;  %2304 = vmatprep.subr.bf16.mxu0 %v2476_v14 }
 0xfe9   :  { %2289 = vmatmul.mubr.msk.bf16.vlgmr.msra.gmra.mxu1 %vm270_vm3, %v1138_v20 }
 0xfea   :  { %2299 = vmatpush3.bf16.xpose.msra.mxu1 %v1293_v21  ;;  %2300 = vmatprep.mubr.msk.bf16.mxu1 %vm2477_vm1, %v2476_v14 }
 0xfeb   :  { %2310 = vmatprep.subr.bf16.mxu1 %v2476_v14 }
 0xfed   :  { %2295 = vmatmul.mubr.msk.bf16.vlgmr.msra.gmra.mxu0 %vm170_vm2, %v1236_v22 }
 0xfee   :  { %2306 = vmatprep.mubr.msk.bf16.mxu0 %vm2477_vm1, %v2476_v14 }
 0xff1   :  { %2301 = vmatmul.mubr.msk.bf16.vlgmr.msra.gmra.mxu1 %vm170_vm2, %v1286_v23 }
 0xff2   :  { %2312 = vmatprep.mubr.msk.bf16.mxu1 %vm2477_vm1, %v2476_v14 }
0x10a5   :  { %v2802_v38 = vpop.f32.mrf.mxu0 }
0x10a7   :  { %v2284_v24 = vpop.f32.mrf.mxu0 }
0x10a8   :  { %v2065_v24 = vld [vmem:[%s2952_s3 + $0x9] ss:$0 sm:$0xff] }
0x10a9   :  { %v1184_v25 = vpop.f32.mrf.mxu0  ;;  %v2804_v28 = vpop.f32.mrf.mxu1 }
0x10ab   :  { %v2285_v29 = vpop.f32.mrf.mxu0  ;;  %v2290_v30 = vpop.f32.mrf.mxu1 }
0x10ad   :  { %v1232_v33 = vpop.f32.mrf.mxu1  ;;  %v1279_v34 = vpop.f32.mrf.mxu0 }
0x10ae   :  { %v1335_v36 = vmul.f32 0.25, %v1279_v34 }
0x10af   :  { %v2291_v37 = vpop.f32.mrf.mxu1  ;;  %v2296_v39 = vpop.f32.mrf.mxu0 }
0x10b0   :  { %v1337_v41 = vadd.f32 %v1335_v36, %v2581_v57 }
0x10b1   :  { %v1282_v44 = vpop.f32.mrf.mxu0  ;;  %v1329_v45 = vpop.f32.mrf.mxu1 }
0x10b2   :  { %v1336_v47 = vmul.f32 0.25, %v1329_v45  ;;  %v1339_v48 = vsel %vm270_vm3, %v1337_v41, -inf }
0x10b3   :  { %v2302_v49 = vpop.f32.mrf.mxu1  ;;  %1340 = vmax.xlane.f32.xlu1 %v1339_v48  ;;  %v2297_v50 = vpop.f32.mrf.mxu0 }
0x10b4   :  { %v1338_v51 = vadd.f32 %v1336_v47, %v2584_v63 }
0x10b5   :  { %v1332_v52 = vpop.f32.mrf.mxu1 }
0x10b6   :  { %v1342_v46 = vsel %vm270_vm3, %v1338_v51, -inf }
0x10b7   :  { %1343 = vmax.xlane.f32.xlu0 %v1342_v46  ;;  %v2303_v53 = vpop.f32.mrf.mxu1  ;;  %v2401_v46 = vld [vmem:[%s2950_s4 + $0x70] sm:$0xff]  }
0x10c4   :  { %1363 = vrot.lane.b32.xlu1 %v2744_v35, %s2483_s11 }
0x113c   :  { %v1341_v43 = vpop.xlane.xlu1 %1340 }
0x113d   :  { %v1345_v57 = vsub.f32 %v1337_v41, %v1341_v43 }
0x113f   :  { %v1347_v54 = vmul.f32 1.442695, %v1345_v57 }
0x1140   :  { %v1344_v55 = vpop.xlane.xlu0 %1343  ;;  %v1364_v56 = vpop.permute.xlu1 %1363 }
0x1141   :  { %2446 = vpow2.f32 %v1347_v54  ;;  %v1346_v58 = vsub.f32 %v1338_v51, %v1344_v55  ;;  %v1369_v59 = vsel %vm300_vm4, %v1364_v56, 0 }
0x1142   :  { %2305 = vmatpush3.bf16.msra.mxu0 %v1369_v59 }
0x1143   :  { %v1349_v60 = vmul.f32 1.442695, %v1346_v58  ;;  %2316 = vmatprep.subr.bf16.mxu0 %v2476_v14 }
0x1145   :  { %2448 = vpow2.f32 %v1349_v60  ;;  %v2071_v60 = vld [vmem:[%s2952_s3 + $0xa] ss:$0 sm:$0xff] }
0x114e   :  { %v2447_v63 = vpop.eup %2446 }
0x114f   :  { %v1351_v61 = vsel %vm270_vm3, %v2447_v63, 0.0 }
0x1150   :  { %1352 = vadd.xlane.f32.xlu0 %v1351_v61 }
0x1152   :  { %v2449_v62 = vpop.eup %2448 }
0x1153   :  { %v1354_v35 = vsel %vm270_vm3, %v2449_v62, 0.0 }
0x1154   :  { %1355 = vadd.xlane.f32.xlu0 %v1354_v35  ;;  %v2072_v35 = vld [vmem:[%s2952_s3 + $0xb] ss:$0 sm:$0xff] }
0x116a   :  { %1411 = vrot.lane.b32.xlu0 %v2748_v40, %s2483_s11 }
0x11d9   :  { %v1353_v0 = vpop.xlane.xlu0 %1352 }
0x11da   :  { %2450 = vrcp.f32 %v1353_v0 }
0x11dd   :  { %v1356_v31 = vpop.xlane.xlu0 %1355 }
0x11de   :  { %2452 = vrcp.f32 %v1356_v31 }
0x11e1   :  { %v1412_v1 = vpop.permute.xlu0 %1411 }
0x11e2   :  { %v1417_v2 = vsel %vm300_vm4, %v1412_v1, 0 }
0x11e3   :  { %2311 = vmatpush3.bf16.msra.mxu1 %v1417_v2 }
0x11e4   :  { %2324 = vmatprep.subr.bf16.mxu1 %v2476_v14 }
0x11e7   :  { %v2451_v32 = vpop.eup %2450 }
0x11e8   :  { %v1358_v3 = vmul.f32 %v2451_v32, %v2447_v63  ;;  %v2402_v32 = vld [vmem:[%s2950_s4 + $0x98] sm:$0xff]  }
0x11ea   :  { %v1361_v4 = vpack.c.bf16 %v1358_v3, %v1358_v3  ;;  %v2403_v3 = vld [vmem:[%s2950_s4 + $0x90] sm:$0xff]  }
0x11eb   :  { %v2453_v5 = vpop.eup %2452 }
0x11ec   :  { %2307 = vmatmul.mubr.msk.bf16.vlgmr.msra.gmra.mxu0 %vm270_vm3, %v1361_v4  ;;  %v1360_v6 = vmul.f32 %v2453_v5, %v2449_v62  ;;  %v2404_v4 = vld [vmem:[%s2950_s4 + $0x88] sm:$0xff]   ;;  %v2405_v5 = vld [vmem:[%s2950_s4 + $0x80] sm:$0xff]  }
0x11ed   :  { %2320 = vmatprep.mubr.msk.bf16.mxu0 %vm2477_vm1, %v2476_v14  ;;  %2317 = vmatpush3.bf16.msra.mxu0 %v2398_v7 }
0x11ee   :  { %v1362_v40 = vpack.c.bf16 %v1360_v6, %v1360_v6  ;;  %2318 = vmatprep.subr.bf16.mxu0 %v2476_v14  ;;  %v2078_v6 = vld [vmem:[%s2952_s3 + $0xc] ss:$0 sm:$0xff] }
0x11f0   :  { %2313 = vmatmul.mubr.msk.bf16.vlgmr.msra.gmra.mxu1 %vm270_vm3, %v1362_v40 }
0x11f1   :  { %2328 = vmatprep.mubr.msk.bf16.mxu1 %vm2477_vm1, %v2476_v14  ;;  %2319 = vmatpush3.bf16.msra.mxu0 %v2399_v8 }
0x11f2   :  { %2332 = vmatprep.subr.bf16.mxu0 %v2476_v14 }
0x12ac   :  { %v1405_v9 = vpop.f32.mrf.mxu0 }
0x12ae   :  { %v2308_v10 = vpop.f32.mrf.mxu0 }
0x12b0   :  { %v1408_v11 = vpop.f32.mrf.mxu0  ;;  %v1453_v12 = vpop.f32.mrf.mxu1 }
0x12b1   :  { %v2381_v13 = vpack.i.bf16 %v1453_v12, %v1405_v9 }
0x12b2   :  { %v2309_v42 = vpop.f32.mrf.mxu0  ;;  %v2314_v15 = vpop.f32.mrf.mxu1 }
0x12b3   :  { %2382 = vrot.lane.b32.xlu1 %v2381_v13, %s2484_s16 }
0x12b4   :  { %v1456_v16 = vpop.f32.mrf.mxu1 }
0x12b6   :  { %v2315_v17 = vpop.f32.mrf.mxu1 }
0x1325   :  { %v2383_v18 = vpop.permute.xlu1 %2382 }
0x1326   :  { %v2385_v19 = vunpack.i.h.bf16 %v2383_v18  ;;  %v2384_v20 = vunpack.i.l.bf16 %v2383_v18 }
0x1328   :  { %v1468_v21 = vsel %vm170_vm2, %v2804_v28, %v2385_v19  ;;  %v1467_v22 = vsel %vm170_vm2, %v2802_v38, %v2384_v20 }
0x1329   :  { %v1469_v23 = vpack.c.bf16 %v1468_v21, %v1467_v22 }
0x132b   :  { %2321 = vmatmul.mubr.msk.bf16.vlgmr.msra.gmra.mxu0 %vm25_vm0, %v1469_v23 }
0x132c   :  { %2340 = vmatprep.mubr.msk.bf16.mxu0 %vm2477_vm1, %v2476_v14  ;;  %2333 = vmatpush3.bf16.msra.mxu0 %v2402_v32 }
0x132d   :  { %2334 = vmatprep.subr.bf16.mxu0 %v2476_v14 }
0x1330   :  { %2335 = vmatpush3.bf16.msra.mxu0 %v2403_v3  ;;  %v2099_v3 = vld [vmem:[%s2952_s3 + $0xe] ss:$0 sm:$0xff] }
0x1331   :  { %2336 = vmatprep.subr.bf16.mxu0 %v2476_v14 }
0x1334   :  { %2337 = vmatpush3.bf16.msra.mxu0 %v2404_v4 }
0x1335   :  { %2338 = vmatprep.subr.bf16.mxu0 %v2476_v14 }
0x1338   :  { %2339 = vmatpush3.bf16.msra.mxu0 %v2405_v5 }
0x13eb   :  { %v1528_v25 = vpop.f32.mrf.mxu0 }
0x13ec   :  { %v1529_v29 = vadd.f32 %v2065_v24, %v1528_v25 }
0x13ed   :  { %v2322_v30 = vpop.f32.mrf.mxu0 }
0x13ee   :  { %v1535_v33 = vadd.f32 %v1529_v29, %v2732_v26 }
0x13ef   :  { %v1531_v34 = vpop.f32.mrf.mxu0 }
0x13f0   :  { %v1532_v28 = vadd.f32 %v2065_v24, %v1531_v34  ;;  %v1539_v36 = vsel %vm25_vm0, %v1535_v33, 0.0 }
0x13f1   :  { %1540 = vadd.xlane.f32.xlu1 %v1539_v36  ;;  %v2323_v38 = vpop.f32.mrf.mxu0  ;;  %v2091_v36 = vld [vmem:[%s2952_s3 + $0xd] ss:$0 sm:$0xff] }
0x13f2   :  { %v1536_v37 = vadd.f32 %v1532_v28, %v2734_v27  ;;  %v2400_v27 = vld [vmem:[%s2950_s4 + $0x78] sm:$0xff]  }
0x13f3   :  { %2325 = vmatpush3.bf16.msra.mxu1 %v2400_v27 }
0x13f4   :  { %v1542_v39 = vsel %vm25_vm0, %v1536_v37, 0.0  ;;  %2326 = vmatprep.subr.bf16.mxu1 %v2476_v14 }
0x13f5   :  { %1543 = vadd.xlane.f32.xlu0 %v1542_v39 }
0x13f7   :  { %2327 = vmatpush3.bf16.msra.mxu1 %v2401_v46 }
0x13f8   :  { %2344 = vmatprep.subr.mxu1 %v2476_v14 }
0x147a   :  { %v1541_v41 = vpop.xlane.xlu1 %1540 }
0x147b   :  { %v1545_v44 = vmul.f32 0.03125, %v1541_v41 }
0x147d   :  { %v1547_v45 = vsub.f32 %v1535_v33, %v1545_v44 }
0x147e   :  { %v1544_v47 = vpop.xlane.xlu0 %1543 }
0x147f   :  { %v1546_v48 = vmul.f32 0.03125, %v1544_v47  ;;  %v1549_v49 = vmul.f32 %v1547_v45, %v1547_v45 }
0x1481   :  { %v1548_v50 = vsub.f32 %v1536_v37, %v1546_v48  ;;  %v1551_v26 = vsel %vm25_vm0, %v1549_v49, 0.0 }
0x1482   :  { %1552 = vadd.xlane.f32.xlu0 %v1551_v26 }
0x1483   :  { %v1550_v51 = vmul.f32 %v1548_v50, %v1548_v50 }
0x1485   :  { %v1554_v52 = vsel %vm25_vm0, %v1550_v51, 0.0 }
0x1486   :  { %1555 = vadd.xlane.f32.xlu1 %v1554_v52 }
0x150b   :  { %v1553_v53 = vpop.xlane.xlu0 %1552 }
0x150c   :  { %v1557_v43 = vmul.f32 0.03125, %v1553_v53 }
0x150e   :  { %v1559_v57 = vadd.f32 1e-12, %v1557_v43 }
0x150f   :  { %v1556_v54 = vpop.xlane.xlu1 %1555 }
0x1510   :  { %2454 = vrsqrt.f32 %v1559_v57  ;;  %v1558_v55 = vmul.f32 0.03125, %v1556_v54 }
0x1512   :  { %v1560_v56 = vadd.f32 1e-12, %v1558_v55 }
0x1514   :  { %2456 = vrsqrt.f32 %v1560_v56  ;;  %v1788_v56 = vld [vmem:[%s2951_s2 + $0x20] sm:$0xff] }
0x151d   :  { %v2455_v58 = vpop.eup %2454 }
0x151e   :  { %v1563_v59 = vmul.f32 %v2455_v58, %v1547_v45  ;;  %v1787_v58 = vld [vmem:[%s2951_s2 + $0x18] sm:$0xff] }
0x1520   :  { %v1569_v62 = vmul.f32 %v2071_v60, %v1563_v59  ;;  %v1786_v59 = vld [vmem:[%s2951_s2 + $0x10] sm:$0xff] }
0x1521   :  { %v2457_v63 = vpop.eup %2456 }
0x1522   :  { %v1564_v61 = vmul.f32 %v2457_v63, %v1548_v50  ;;  %v1575_v31 = vadd.f32 %v2072_v35, %v1569_v62 }
0x1524   :  { %v1570_v0 = vmul.f32 %v2071_v60, %v1564_v61  ;;  %v1785_v60 = vld [vmem:[%s2951_s2 + $0x8] sm:$0xff] }
0x1526   :  { %v1576_v1 = vadd.f32 %v2072_v35, %v1570_v0 }
0x1528   :  { %v1577_v2 = vpack.c.bf16 %v1576_v1, %v1575_v31 }
0x152a   :  { %2329 = vmatmul.mubr.msk.bf16.vlgmr.msra.gmra.mxu1 %vm25_vm0, %v1577_v2 }
0x152b   :  { %2352 = vmatprep.mubr.msk.f32.mxu1 %vm2477_vm1, %v2476_v14  ;;  %2345 = vmatpush3.msra.mxu1 %v1788_v56 }
0x152c   :  { %2346 = vmatprep.subr.mxu1 %v2476_v14 }
0x152d   :  { %2347 = vmatpush3.msra.mxu1 %v1787_v58 }
0x152e   :  { %2348 = vmatprep.subr.mxu1 %v2476_v14 }
0x152f   :  { %2349 = vmatpush3.msra.mxu1 %v1786_v59 }
0x1530   :  { %2350 = vmatprep.subr.mxu1 %v2476_v14 }
0x1531   :  { %2351 = vmatpush3.msra.mxu1 %v1785_v60 }
0x1532   :  { %2355 = vmatprep.subr.mxu1 %v2476_v14 }
0x15ea   :  { %v1636_v40 = vpop.f32.mrf.mxu1 }
0x15eb   :  { %v1637_v7 = vadd.f32 %v2078_v6, %v1636_v40  ;;  %v2100_v40 = vld [vmem:[%s2952_s3 + $0xf] ss:$0 sm:$0xff] }
0x15ec   :  { %v2330_v8 = vpop.f32.mrf.mxu1 }
0x15ed   :  { %v1643_v9 = vmul.f32 %v1637_v7, %v1637_v7 }
0x15ee   :  { %v1639_v10 = vpop.f32.mrf.mxu1 }
0x15ef   :  { %v1645_v11 = vmul.f32 %v1643_v9, %v1637_v7  ;;  %v1640_v12 = vadd.f32 %v2078_v6, %v1639_v10 }
0x15f0   :  { %v2331_v13 = vpop.f32.mrf.mxu1 }
0x15f1   :  { %v1647_v42 = vmul.f32 0.044715, %v1645_v11  ;;  %v1644_v15 = vmul.f32 %v1640_v12, %v1640_v12 }
0x15f3   :  { %v1649_v16 = vadd.f32 %v1647_v42, %v1637_v7  ;;  %v1646_v17 = vmul.f32 %v1644_v15, %v1640_v12  ;;  %v2101_v15 = vld [vmem:[%s2951_s2 + $0x2] ss:$0 sm:$0xff] }
0x15f5   :  { %v1651_v18 = vmul.f32 0.7978846, %v1649_v16  ;;  %v1648_v19 = vmul.f32 0.044715, %v1646_v17 }
0x15f7   :  { %2458 = vtanh.f32 %v1651_v18  ;;  %v1650_v20 = vadd.f32 %v1648_v19, %v1640_v12 }
0x15f9   :  { %v1652_v21 = vmul.f32 0.7978846, %v1650_v20 }
0x15fb   :  { %2460 = vtanh.f32 %v1652_v21 }
0x1604   :  { %v2459_v22 = vpop.eup %2458 }
0x1605   :  { %v1655_v23 = vadd.f32 1.0, %v2459_v22 }
0x1607   :  { %v1657_v25 = vmul.f32 0.5, %v1655_v23 }
0x1608   :  { %v2461_v24 = vpop.eup %2460 }
0x1609   :  { %v1656_v29 = vadd.f32 1.0, %v2461_v24  ;;  %v1659_v33 = vmul.f32 %v1657_v25, %v1637_v7 }
0x160b   :  { %v1658_v30 = vmul.f32 0.5, %v1656_v29 }
0x160d   :  { %v1660_v34 = vmul.f32 %v1658_v30, %v1640_v12 }
0x160f   :  { %v1661_v28 = vpack.c.bf16 %v1660_v34, %v1659_v33 }
0x1611   :  { %2341 = vmatmul.mubr.msk.bf16.vlgmr.msra.gmra.mxu0 %vm856_vm5, %v1661_v28 }
0x16d1   :  { %v1736_v38 = vpop.f32.mrf.mxu0 }
0x16d2   :  { %v1737_v37 = vadd.f32 %v2091_v36, %v1736_v38 }
0x16d3   :  { %v2342_v39 = vpop.f32.mrf.mxu0 }
0x16d4   :  { %v1743_v41 = vadd.f32 %v1737_v37, %v1575_v31 }
0x16d5   :  { %v1739_v44 = vpop.f32.mrf.mxu0 }
0x16d6   :  { %v1740_v45 = vadd.f32 %v2091_v36, %v1739_v44  ;;  %v1747_v47 = vsel %vm25_vm0, %v1743_v41, 0.0 }
0x16d7   :  { %1748 = vadd.xlane.f32.xlu1 %v1747_v47  ;;  %v2343_v48 = vpop.f32.mrf.mxu0 }
0x16d8   :  { %v1744_v49 = vadd.f32 %v1740_v45, %v1576_v1 }
0x16da   :  { %v1750_v50 = vsel %vm25_vm0, %v1744_v49, 0.0 }
0x16db   :  { %1751 = vadd.xlane.f32.xlu0 %v1750_v50 }
0x1760   :  { %v1749_v26 = vpop.xlane.xlu1 %1748 }
0x1761   :  { %v1753_v51 = vmul.f32 0.03125, %v1749_v26 }
0x1763   :  { %v1755_v52 = vsub.f32 %v1743_v41, %v1753_v51 }
0x1764   :  { %v1752_v27 = vpop.xlane.xlu0 %1751 }
0x1765   :  { %v1754_v46 = vmul.f32 0.03125, %v1752_v27  ;;  %v1757_v53 = vmul.f32 %v1755_v52, %v1755_v52 }
0x1767   :  { %v1756_v43 = vsub.f32 %v1744_v49, %v1754_v46  ;;  %v1759_v57 = vsel %vm25_vm0, %v1757_v53, 0.0 }
0x1768   :  { %1760 = vadd.xlane.f32.xlu1 %v1759_v57 }
0x1769   :  { %v1758_v54 = vmul.f32 %v1756_v43, %v1756_v43 }
0x176b   :  { %v1762_v55 = vsel %vm25_vm0, %v1758_v54, 0.0 }
0x176c   :  { %1763 = vadd.xlane.f32.xlu0 %v1762_v55 }
0x1779   :  { %1885 = vrot.lane.b32.xlu1 %v1787_v58, %s2478_s6 }
0x177d   :  { %1883 = vrot.lane.b32.xlu1 %v1786_v59, %s2478_s6 }
0x1781   :  { %1881 = vrot.lane.b32.xlu1 %v1785_v60, %s2478_s6 }
0x1782   :  { %1887 = vrot.lane.b32.xlu0 %v1788_v56, %s2478_s6 }
0x17f1   :  { %v1761_v63 = vpop.xlane.xlu1 %1760 }
0x17f2   :  { %v1765_v61 = vmul.f32 0.03125, %v1761_v63 }
0x17f4   :  { %v1767_v62 = vadd.f32 1e-12, %v1765_v61 }
0x17f5   :  { %v1764_v35 = vpop.xlane.xlu0 %1763  ;;  %v1886_v12 = vpop.permute.xlu1 %1885 }
0x17f6   :  { %2462 = vrsqrt.f32 %v1767_v62  ;;  %v1766_v0 = vmul.f32 0.03125, %v1764_v35 }
0x17f8   :  { %v1768_v31 = vadd.f32 1e-12, %v1766_v0 }
0x17f9   :  { %v1888_v11 = vpop.permute.xlu0 %1887  ;;  %v1884_v13 = vpop.permute.xlu1 %1883 }
0x17fa   :  { %2464 = vrsqrt.f32 %v1768_v31 }
0x17fd   :  { %v1882_v42 = vpop.permute.xlu1 %1881 }
0x1803   :  { %v2463_v1 = vpop.eup %2462 }
0x1804   :  { %v1771_v2 = vmul.f32 %v2463_v1, %v1755_v52 }
0x1806   :  { %v1777_v5 = vmul.f32 %v2099_v3, %v1771_v2 }
0x1807   :  { %v2465_v32 = vpop.eup %2464 }
0x1808   :  { %v1772_v4 = vmul.f32 %v2465_v32, %v1756_v43  ;;  %v1783_v8 = vadd.f32 %v2100_v40, %v1777_v5 }
0x180a   :  { %v1778_v6 = vmul.f32 %v2099_v3, %v1772_v4 }
0x180c   :  { %v1784_v7 = vadd.f32 %v2100_v40, %v1778_v6 }
0x180e   :  { %v1796_v9 = vrot.slane %v1784_v7, 7 }
0x1810   :  { %v1798_v10 = vsel %vm1797_vm6, %v1796_v9, %v1783_v8 }
0x1811   :  { %2353 = vmatmul.mubr.msk.f32.vlgmr.msra.gmra.mxu1 %vm25_vm0, %v1798_v10 }
0x1812   :  { %2363 = vmatprep.mubr.msk.f32.mxu1 %vm2477_vm1, %v2476_v14  ;;  %2356 = vmatpush3.msra.mxu1 %v1888_v11 }
0x1813   :  { %2357 = vmatprep.subr.mxu1 %v2476_v14 }
0x1814   :  { %2358 = vmatpush3.msra.mxu1 %v1886_v12 }
0x1815   :  { %2359 = vmatprep.subr.mxu1 %v2476_v14 }
0x1816   :  { %2360 = vmatpush3.msra.mxu1 %v1884_v13 }
0x1817   :  { %2361 = vmatprep.subr.mxu1 %v2476_v14  ;;  %v2103_v14 = vld [vmem:[%s2951_s2 + $0x3] ss:$0 sm:$0xff]  ;;  %s2485_s2 = smov 32  }
0x1818   :  { %2362 = vmatpush3.msra.mxu1 %v1882_v42 }
0x18d1   :  { %v1867_v16 = vpop.f32.mrf.mxu1 }
0x18d2   :  { %v1868_v17 = vadd.f32 %v2101_v15, %v1867_v16 }
0x18d3   :  { %v2354_v18 = vpop.f32.mrf.mxu1 }
0x18d4   :  { %2466 = vtanh.f32 %v1868_v17 }
0x18e1   :  { %v2467_v19 = vpop.eup %2466 }
0x18e2   :  { %2364 = vmatmul.mubr.msk.f32.vlgmr.msra.gmra.mxu1 %vm25_vm0, %v2467_v19  ;;  %1987 = vst.msk [vmem:[%s2954_s5] sm:$0x3] %vm1986_vm7, %v2467_v19 }
0x19a2   :  { %v1962_v20 = vpop.f32.mrf.mxu1 }
0x19a3   :  { %v1963_v21 = vadd.f32 %v2103_v14, %v1962_v20 }
0x19a4   :  { %v2365_v22 = vpop.f32.mrf.mxu1 }
0x19a5   :  { %v1967_v23 = vsel %vm1966_vm8, %v1963_v21, -inf  ;;  %v2105_v24 = vmul.f32 -1.442695, %v1963_v21 }
0x19a6   :  { %1968 = vmax.xlane.f32.xlu0 %v1967_v23 }
0x19a7   :  { %2468 = vpow2.f32 %v2105_v24 }
0x19b4   :  { %v2469_v33 = vpop.eup %2468 }
0x19b5   :  { %v1981_v28 = vadd.f32 1.0, %v2469_v33 }
0x1a2f   :  { %v1969_v25 = vpop.xlane.xlu0 %1968 }
0x1a30   :  { %v1970_v29 = vsub.f32 %v1963_v21, %v1969_v25 }
0x1a32   :  { %v1971_v30 = vmul.f32 1.442695, %v1970_v29 }
0x1a34   :  { %2470 = vpow2.f32 %v1971_v30 }
0x1a35   :  { %2472 = vrcp.f32 %v1981_v28 }
0x1a41   :  { %v2471_v34 = vpop.eup %2470 }
0x1a42   :  { %v1973_v36 = vsel %vm1966_vm8, %v2471_v34, 0.0  ;;  %v2473_v38 = vpop.eup %2472 }
0x1a43   :  { %1974 = vadd.xlane.f32.xlu1 %v1973_v36  ;;  %v1984_v44 = vmul.f32 5.0, %v2473_v38 }
0x1a54   :  { %1995 = vrot.lane.b32.xlu1 %v2473_v38, %s2485_s2 }
0x1acc   :  { %v1975_v37 = vpop.xlane.xlu1 %1974 }
0x1acd   :  { %2474 = vrcp.f32 %v1975_v37 }
0x1ad0   :  { %v1996_v47 = vpop.permute.xlu1 %1995 }
0x1ada   :  { %v2475_v39 = vpop.eup %2474 }
0x1adb   :  { %v1977_v41 = vmul.f32 %v2475_v39, %v2471_v34 }
0x1add   :  { %1989 = vrot.lane.b32.xlu0 %v1977_v41, %s2485_s2 }
0x1ae1   :  { %2001 = vrot.lane.b32.xlu0 %v1984_v44, %s2485_s2 }
0x1b4f   :  { %v1990_v45 = vpop.permute.xlu0 %1989 }
0x1b50   :  { %1993 = vst.msk [vmem:[%s2954_s5] sm:$0x3] %vm1992_vm9, %v1990_v45 }
0x1b51   :  { %1999 = vst.msk [vmem:[%s2954_s5] sm:$0x3] %vm1998_vm10, %v1996_v47 }
0x1b53   :  { %v2002_v48 = vpop.permute.xlu0 %2001 }
0x1b54   :  { %2005 = vst.msk [vmem:[%s2954_s5] sm:$0x3] %vm2004_vm11, %v2002_v48 }

</bundles_post_ra>
